<compile_context>
chip_gen: v7x
topology: tpu7x:2x2x1
jax: 0.10.0
libtpu: 0.0.40
codegen_flags: <defaults>
</compile_context>

<pallas_src>
import functools

import jax
import jax.numpy as jnp
from jax import lax
from jax.experimental import pallas as pl
from jax.experimental.pallas import tpu as pltpu

_NEG_BIG = -1e30  # finite "minus infinity" bias for masked (padded) keys


def _flash_mha_kernel(q_ref, k_ref, v_ref, o_ref, m_sc, l_sc, acc_sc, *,
                      heads, head_dim, scale, kv_len, block_kv, mask_kv):
    """One (batch, q-tile, kv-tile) step of flash attention.

    Block shapes:
      q_ref   (1, TQ,  heads*head_dim)
      k_ref   (1, TKV, heads*head_dim)
      v_ref   (1, TKV, heads*head_dim)
      o_ref   (1, TQ,  heads*head_dim)
      m_sc / l_sc : (TQ, heads)          f32 running max / running sum
      acc_sc      : (TQ, heads*head_dim) f32 output accumulator
    """
    ki = pl.program_id(2)

    @pl.when(ki == 0)
    def _init():
        m_sc[...] = jnp.full_like(m_sc, -jnp.inf)
        l_sc[...] = jnp.zeros_like(l_sc)
        acc_sc[...] = jnp.zeros_like(acc_sc)

    q = q_ref[0]                          # (TQ,  H*D) in the input dtype
    k = k_ref[0]                          # (TKV, H*D)
    v = v_ref[0]                          # (TKV, H*D)

    # Fold the softmax scale into the small Q tile (TQ x H*D) instead of the
    # per-head (TQ x TKV) score tensors.
    q = q * scale

    low_precision_exp = q.dtype == jnp.bfloat16

    if mask_kv:
        # Static: only emitted when the KV length was padded to the tile.
        col = lax.broadcasted_iota(jnp.int32, (q.shape[0], k.shape[0]), 1)
        kv_valid = (ki * block_kv + col) < kv_len          # (TQ, TKV) bool

    for h in range(heads):                # static unroll: plain 2-D MXU matmuls
        dsl = slice(h * head_dim, (h + 1) * head_dim)      # lane slice of head h
        hsl = slice(h, h + 1)

        qh = q[:, dsl]                                     # (TQ, D)
        kh = k[:, dsl]                                     # (TKV, D)
        vh = v[:, dsl]                                     # (TKV, D)

        # scores: contract D of both operands (A @ B^T form), f32 accumulate.
        s = lax.dot_general(qh, kh, (((1,), (1,)), ((), ())),
                            preferred_element_type=jnp.float32)   # (TQ, TKV)
        if mask_kv:
            s = jnp.where(kv_valid, s, _NEG_BIG)

        m_prev = m_sc[:, hsl]                              # (TQ, 1) f32
        m_new = jnp.maximum(m_prev, jnp.max(s, axis=-1, keepdims=True))
        alpha = jnp.exp(m_prev - m_new)                    # (TQ, 1) f32

        x = s - m_new
        if low_precision_exp:
            # bf16 EUP path: p gets cast to bf16 for the PV matmul anyway.
            x = x.astype(jnp.bfloat16)
        p = jnp.exp(x)                                     # (TQ, TKV)

        l_sc[:, hsl] = alpha * l_sc[:, hsl] + jnp.sum(
            p.astype(jnp.float32), axis=-1, keepdims=True)

        pv = lax.dot_general(p.astype(vh.dtype), vh,
                             (((1,), (0,)), ((), ())),
                             preferred_element_type=jnp.float32)  # (TQ, D)
        acc_sc[:, dsl] = alpha * acc_sc[:, dsl] + pv
        m_sc[:, hsl] = m_new

    @pl.when(ki == pl.num_programs(2) - 1)
    def _finalize():
        inv_l = pl.reciprocal(l_sc[...], approx=False)     # (TQ, heads), exact
        for h in range(heads):
            dsl = slice(h * head_dim, (h + 1) * head_dim)
            acc_sc[:, dsl] = acc_sc[:, dsl] * inv_l[:, h:h + 1]
        # Single dense, full-lane-width store of the whole (TQ, H*D) tile.
        o_ref[0] = acc_sc[...].astype(o_ref.dtype)


def _round_up(n, m):
    return ((n + m - 1) // m) * m


def _pick_tile(n, candidates):
    """Exact divisor if possible, else the candidate minimising padding;
    tiny extents collapse to one 8-aligned tile (never a full-seq K/V slab)."""
    if n <= candidates[-1]:
        return _round_up(n, 8)
    for c in candidates:
        if n % c == 0:
            return c
    return min(candidates, key=lambda c: (_round_up(n, c) - n, -c))


def multi_head_attention(Q, K, V, *, heads):
    """Q: (B, I, heads*D), K/V: (B, J, heads*D) -> (B, I, heads*D)."""
    B, I, HD = Q.shape
    _, J, _ = K.shape
    assert HD % heads == 0, "hidden dim must be divisible by heads"
    D = HD // heads
    scale = float(D) ** (-0.5)            # (dim / heads) ** (-0.5)

    # Large TQ amortises K/V re-streaming from HBM; TKV keeps the MXU N dim
    # filled.  Working set per step stays a few MiB even for large heads*D.
    TQ = _pick_tile(I, (512, 256, 128))
    TKV = _pick_tile(J, (256, 128))
    I_pad = _round_up(I, TQ)
    J_pad = _round_up(J, TKV)

    q = Q if I_pad == I else jnp.pad(Q, ((0, 0), (0, I_pad - I), (0, 0)))
    k = K if J_pad == J else jnp.pad(K, ((0, 0), (0, J_pad - J), (0, 0)))
    v = V if J_pad == J else jnp.pad(V, ((0, 0), (0, J_pad - J), (0, 0)))

    grid = (B, I_pad // TQ, J_pad // TKV)   # KV (reduction) axis last

    kernel = functools.partial(
        _flash_mha_kernel, heads=heads, head_dim=D, scale=scale,
        kv_len=J, block_kv=TKV, mask_kv=(J_pad != J))

    itemsize = Q.dtype.itemsize
    n_q_tiles = I_pad // TQ
    cost = pl.CostEstimate(
        flops=int(4 * B * heads * I_pad * J_pad * D),
        transcendentals=int(B * heads * I_pad * J_pad),
        bytes_accessed=int((2 * B * I_pad * HD                 # Q read + O write
                            + 2 * B * J_pad * HD * n_q_tiles)  # K,V re-streamed
                           * itemsize),
    )

    out = pl.pallas_call(
        kernel,
        out_shape=jax.ShapeDtypeStruct((B, I_pad, HD), Q.dtype),
        grid_spec=pltpu.PrefetchScalarGridSpec(
            num_scalar_prefetch=0,
            grid=grid,
            in_specs=[
                pl.BlockSpec((1, TQ, HD), lambda b, qi, ki: (b, qi, 0)),
                pl.BlockSpec((1, TKV, HD), lambda b, qi, ki: (b, ki, 0)),
                pl.BlockSpec((1, TKV, HD), lambda b, qi, ki: (b, ki, 0)),
            ],
            out_specs=pl.BlockSpec((1, TQ, HD), lambda b, qi, ki: (b, qi, 0)),
            scratch_shapes=[
                pltpu.VMEM((TQ, heads), jnp.float32),   # running max
                pltpu.VMEM((TQ, heads), jnp.float32),   # running sum
                pltpu.VMEM((TQ, HD), jnp.float32),      # output accumulator
            ],
        ),
        compiler_params=pltpu.CompilerParams(
            # KV axis is the reduction; batch and Q-tile axes shard across TCs.
            dimension_semantics=("parallel", "parallel", "arbitrary"),
            vmem_limit_bytes=32 * 1024 * 1024,
        ),
        cost_estimate=cost,
    )(q, k, v)

    if I_pad != I:
        out = out[:, :I, :]
    return out


def _reference(Q, K, V, *, heads):
    B, I, HD = Q.shape
    _, J, _ = K.shape
    D = HD // heads
    scale = float(D) ** (-0.5)
    q = Q.reshape(B, I, heads, D).transpose(0, 2, 1, 3)
    k = K.reshape(B, J, heads, D).transpose(0, 2, 1, 3)
    v = V.reshape(B, J, heads, D).transpose(0, 2, 1, 3)
    dots = jnp.einsum('bhid,bhjd->bhij', q, k, precision='highest') * scale
    attn = jax.nn.softmax(dots, axis=-1)
    out = jnp.einsum('bhij,bhjd->bhid', attn, v, precision='highest')
    return out.transpose(0, 2, 1, 3).reshape(B, I, heads * D)


if __name__ == "__main__":
    # small shapes consistent with the module: batch=2, seq=16, dim=32, heads=4
    B, SEQ, DIM, HEADS = 2, 16, 32, 4
    key = jax.random.PRNGKey(0)
    kq, kk, kv = jax.random.split(key, 3)
    Q = jax.random.normal(kq, (B, SEQ, DIM), dtype=jnp.float32)
    K = jax.random.normal(kk, (B, SEQ, DIM), dtype=jnp.float32)
    V = jax.random.normal(kv, (B, SEQ, DIM), dtype=jnp.float32)

    out = multi_head_attention(Q, K, V, heads=HEADS)
    out = jax.block_until_ready(out)

    ref = _reference(Q, K, V, heads=HEADS)
    assert out.shape == (B, SEQ, DIM)
    # Tolerance covers MXU matmul-precision differences between the fused
    # kernel (default-precision f32 dots) and the 'highest'-precision
    # reference einsums.
    assert jnp.allclose(out, ref, atol=2e-2, rtol=2e-2), "mismatch vs reference"

    print("KERNEL_OK")
</pallas_src>

<mosaic_0001>
module attributes {stable_mosaic.version = 11 : i64} {
  func.func @_flash_mha_kernel(%arg0: i32, %arg1: i32, %arg2: i32, %arg3: memref<1x16x32xf32, #tpu.memory_space<vmem>>, %arg4: memref<1x16x32xf32, #tpu.memory_space<vmem>>, %arg5: memref<1x16x32xf32, #tpu.memory_space<vmem>>, %arg6: memref<1x16x32xf32, #tpu.memory_space<vmem>>, %arg7: memref<16x4xf32, #tpu.memory_space<vmem>>, %arg8: memref<16x4xf32, #tpu.memory_space<vmem>>, %arg9: memref<16x32xf32, #tpu.memory_space<vmem>>) attributes {dimension_semantics = [#tpu.dimension_semantics<parallel>, #tpu.dimension_semantics<parallel>, #tpu.dimension_semantics<arbitrary>], iteration_bounds = array<i64: 2, 1, 1>, scalar_prefetch = 0 : i64, scratch_operands = 3 : i64, tpu.core_type = #tpu.core_type<tc>, window_params = [{transform_indices = @transform_0, window_bounds = array<i64: 1, 16, 32>}, {transform_indices = @transform_1, window_bounds = array<i64: 1, 16, 32>}, {transform_indices = @transform_2, window_bounds = array<i64: 1, 16, 32>}, {transform_indices = @transform_3, window_bounds = array<i64: 1, 16, 32>}]} {
    %c0_i32 = arith.constant 0 : i32
    %0 = arith.cmpi eq, %arg2, %c0_i32 : i32
    %1 = arith.extui %0 : i1 to i32
    %c0_i32_0 = arith.constant 0 : i32
    %2 = arith.cmpi ne, %1, %c0_i32_0 : i32
    scf.if %2 {
      %cst_69 = arith.constant 0xFF800000 : f32
      %118 = vector.broadcast %cst_69 : f32 to vector<16x4xf32>
      %c0_70 = arith.constant 0 : index
      %c0_71 = arith.constant 0 : index
      %119 = vector.load %arg7[%c0_70, %c0_71] : memref<16x4xf32, #tpu.memory_space<vmem>>, vector<16x4xf32>
      tpu.vector_store %arg7[%c0_70, %c0_71], %118 {strides = array<i32>} : memref<16x4xf32, #tpu.memory_space<vmem>>, vector<16x4xf32>,
      %cst_72 = arith.constant 0.000000e+00 : f32
      %120 = vector.broadcast %cst_72 : f32 to vector<16x4xf32>
      %c0_73 = arith.constant 0 : index
      %c0_74 = arith.constant 0 : index
      %121 = vector.load %arg8[%c0_73, %c0_74] : memref<16x4xf32, #tpu.memory_space<vmem>>, vector<16x4xf32>
      tpu.vector_store %arg8[%c0_73, %c0_74], %120 {strides = array<i32>} : memref<16x4xf32, #tpu.memory_space<vmem>>, vector<16x4xf32>,
      %cst_75 = arith.constant 0.000000e+00 : f32
      %122 = vector.broadcast %cst_75 : f32 to vector<16x32xf32>
      %c0_76 = arith.constant 0 : index
      %c0_77 = arith.constant 0 : index
      %123 = vector.load %arg9[%c0_76, %c0_77] : memref<16x32xf32, #tpu.memory_space<vmem>>, vector<16x32xf32>
      tpu.vector_store %arg9[%c0_76, %c0_77], %122 {strides = array<i32>} : memref<16x32xf32, #tpu.memory_space<vmem>>, vector<16x32xf32>,
    } else {
    }
    %c0 = arith.constant 0 : index
    %c0_1 = arith.constant 0 : index
    %c0_2 = arith.constant 0 : index
    %3 = vector.load %arg3[%c0, %c0_1, %c0_2] : memref<1x16x32xf32, #tpu.memory_space<vmem>>, vector<1x16x32xf32>
    %4 = vector.shape_cast %3 : vector<1x16x32xf32> to vector<16x32xf32>
    %c0_3 = arith.constant 0 : index
    %c0_4 = arith.constant 0 : index
    %c0_5 = arith.constant 0 : index
    %5 = vector.load %arg4[%c0_3, %c0_4, %c0_5] : memref<1x16x32xf32, #tpu.memory_space<vmem>>, vector<1x16x32xf32>
    %6 = vector.shape_cast %5 : vector<1x16x32xf32> to vector<16x32xf32>
    %c0_6 = arith.constant 0 : index
    %c0_7 = arith.constant 0 : index
    %c0_8 = arith.constant 0 : index
    %7 = vector.load %arg5[%c0_6, %c0_7, %c0_8] : memref<1x16x32xf32, #tpu.memory_space<vmem>>, vector<1x16x32xf32>
    %8 = vector.shape_cast %7 : vector<1x16x32xf32> to vector<16x32xf32>
    %cst = arith.constant 0.353553385 : f32
    %9 = vector.broadcast %cst : f32 to vector<16x32xf32>
    %10 = arith.mulf %4, %9 : vector<16x32xf32>
    %11 = vector.extract_strided_slice %10 {offsets = [0, 0], sizes = [16, 8], strides = [1, 1]} : vector<16x32xf32> to vector<16x8xf32>
    %12 = vector.extract_strided_slice %6 {offsets = [0, 0], sizes = [16, 8], strides = [1, 1]} : vector<16x32xf32> to vector<16x8xf32>
    %13 = vector.extract_strided_slice %8 {offsets = [0, 0], sizes = [16, 8], strides = [1, 1]} : vector<16x32xf32> to vector<16x8xf32>
    %cst_9 = arith.constant dense<0.000000e+00> : vector<16x16xf32>
    %14 = tpu.matmul %11, %12, %cst_9 {dimension_numbers = #tpu.dot_dimension_numbers<[1], [1], [0], [0], [0, 0, 1, 0], [], []>} : vector<16x8xf32>, vector<16x8xf32>, vector<16x16xf32> -> vector<16x16xf32>
    %c0_10 = arith.constant 0 : index
    %c0_11 = arith.constant 0 : index
    %15 = vector.load %arg7[%c0_10, %c0_11] : memref<16x4xf32, #tpu.memory_space<vmem>>, vector<16x1xf32>
    %cst_12 = arith.constant dense<0xFF800000> : vector<16xf32>
    %16 = vector.multi_reduction <maximumf>, %14, %cst_12 [1] : vector<16x16xf32> to vector<16xf32>
    %17 = vector.shape_cast %16 : vector<16xf32> to vector<16x1xf32>
    %18 = arith.maximumf %15, %17 : vector<16x1xf32>
    %19 = arith.subf %15, %18 : vector<16x1xf32>
    %20 = math.exp %19 : vector<16x1xf32>
    %21 = vector.broadcast %18 : vector<16x1xf32> to vector<16x16xf32>
    %22 = arith.subf %14, %21 : vector<16x16xf32>
    %23 = math.exp %22 : vector<16x16xf32>
    %c0_13 = arith.constant 0 : index
    %c0_14 = arith.constant 0 : index
    %24 = vector.load %arg8[%c0_13, %c0_14] : memref<16x4xf32, #tpu.memory_space<vmem>>, vector<16x1xf32>
    %25 = arith.mulf %20, %24 : vector<16x1xf32>
    %cst_15 = arith.constant dense<0.000000e+00> : vector<16xf32>
    %26 = vector.multi_reduction <add>, %23, %cst_15 [1] : vector<16x16xf32> to vector<16xf32>
    %27 = vector.shape_cast %26 : vector<16xf32> to vector<16x1xf32>
    %28 = arith.addf %25, %27 : vector<16x1xf32>
    %c0_16 = arith.constant 0 : index
    %c0_17 = arith.constant 0 : index
    %29 = vector.load %arg8[%c0_16, %c0_17] : memref<16x4xf32, #tpu.memory_space<vmem>>, vector<16x1xf32>
    tpu.vector_store %arg8[%c0_16, %c0_17], %28 {strides = array<i32>} : memref<16x4xf32, #tpu.memory_space<vmem>>, vector<16x1xf32>,
    %cst_18 = arith.constant dense<0.000000e+00> : vector<16x8xf32>
    %30 = tpu.matmul %23, %13, %cst_18 {dimension_numbers = #tpu.dot_dimension_numbers<[1], [0], [0], [1], [0, 0, 1, 1], [], []>} : vector<16x16xf32>, vector<16x8xf32>, vector<16x8xf32> -> vector<16x8xf32>
    %c0_19 = arith.constant 0 : index
    %c0_20 = arith.constant 0 : index
    %31 = vector.load %arg9[%c0_19, %c0_20] : memref<16x32xf32, #tpu.memory_space<vmem>>, vector<16x8xf32>
    %32 = vector.broadcast %20 : vector<16x1xf32> to vector<16x8xf32>
    %33 = arith.mulf %32, %31 : vector<16x8xf32>
    %34 = arith.addf %33, %30 : vector<16x8xf32>
    %c0_21 = arith.constant 0 : index
    %c0_22 = arith.constant 0 : index
    %35 = vector.load %arg9[%c0_21, %c0_22] : memref<16x32xf32, #tpu.memory_space<vmem>>, vector<16x8xf32>
    tpu.vector_store %arg9[%c0_21, %c0_22], %34 {strides = array<i32>} : memref<16x32xf32, #tpu.memory_space<vmem>>, vector<16x8xf32>,
    %c0_23 = arith.constant 0 : index
    %c0_24 = arith.constant 0 : index
    %36 = vector.load %arg7[%c0_23, %c0_24] : memref<16x4xf32, #tpu.memory_space<vmem>>, vector<16x1xf32>
    tpu.vector_store %arg7[%c0_23, %c0_24], %18 {strides = array<i32>} : memref<16x4xf32, #tpu.memory_space<vmem>>, vector<16x1xf32>,
    %37 = vector.extract_strided_slice %10 {offsets = [0, 8], sizes = [16, 8], strides = [1, 1]} : vector<16x32xf32> to vector<16x8xf32>
    %38 = vector.extract_strided_slice %6 {offsets = [0, 8], sizes = [16, 8], strides = [1, 1]} : vector<16x32xf32> to vector<16x8xf32>
    %39 = vector.extract_strided_slice %8 {offsets = [0, 8], sizes = [16, 8], strides = [1, 1]} : vector<16x32xf32> to vector<16x8xf32>
    %cst_25 = arith.constant dense<0.000000e+00> : vector<16x16xf32>
    %40 = tpu.matmul %37, %38, %cst_25 {dimension_numbers = #tpu.dot_dimension_numbers<[1], [1], [0], [0], [0, 0, 1, 0], [], []>} : vector<16x8xf32>, vector<16x8xf32>, vector<16x16xf32> -> vector<16x16xf32>
    %c0_26 = arith.constant 0 : index
    %c1 = arith.constant 1 : index
    %41 = vector.load %arg7[%c0_26, %c1] : memref<16x4xf32, #tpu.memory_space<vmem>>, vector<16x1xf32>
    %cst_27 = arith.constant dense<0xFF800000> : vector<16xf32>
    %42 = vector.multi_reduction <maximumf>, %40, %cst_27 [1] : vector<16x16xf32> to vector<16xf32>
    %43 = vector.shape_cast %42 : vector<16xf32> to vector<16x1xf32>
    %44 = arith.maximumf %41, %43 : vector<16x1xf32>
    %45 = arith.subf %41, %44 : vector<16x1xf32>
    %46 = math.exp %45 : vector<16x1xf32>
    %47 = vector.broadcast %44 : vector<16x1xf32> to vector<16x16xf32>
    %48 = arith.subf %40, %47 : vector<16x16xf32>
    %49 = math.exp %48 : vector<16x16xf32>
    %c0_28 = arith.constant 0 : index
    %c1_29 = arith.constant 1 : index
    %50 = vector.load %arg8[%c0_28, %c1_29] : memref<16x4xf32, #tpu.memory_space<vmem>>, vector<16x1xf32>
    %51 = arith.mulf %46, %50 : vector<16x1xf32>
    %cst_30 = arith.constant dense<0.000000e+00> : vector<16xf32>
    %52 = vector.multi_reduction <add>, %49, %cst_30 [1] : vector<16x16xf32> to vector<16xf32>
    %53 = vector.shape_cast %52 : vector<16xf32> to vector<16x1xf32>
    %54 = arith.addf %51, %53 : vector<16x1xf32>
    %c0_31 = arith.constant 0 : index
    %c1_32 = arith.constant 1 : index
    %55 = vector.load %arg8[%c0_31, %c1_32] : memref<16x4xf32, #tpu.memory_space<vmem>>, vector<16x1xf32>
    tpu.vector_store %arg8[%c0_31, %c1_32], %54 {strides = array<i32>} : memref<16x4xf32, #tpu.memory_space<vmem>>, vector<16x1xf32>,
    %cst_33 = arith.constant dense<0.000000e+00> : vector<16x8xf32>
    %56 = tpu.matmul %49, %39, %cst_33 {dimension_numbers = #tpu.dot_dimension_numbers<[1], [0], [0], [1], [0, 0, 1, 1], [], []>} : vector<16x16xf32>, vector<16x8xf32>, vector<16x8xf32> -> vector<16x8xf32>
    %c0_34 = arith.constant 0 : index
    %c8 = arith.constant 8 : index
    %57 = vector.load %arg9[%c0_34, %c8] : memref<16x32xf32, #tpu.memory_space<vmem>>, vector<16x8xf32>
    %58 = vector.broadcast %46 : vector<16x1xf32> to vector<16x8xf32>
    %59 = arith.mulf %58, %57 : vector<16x8xf32>
    %60 = arith.addf %59, %56 : vector<16x8xf32>
    %c0_35 = arith.constant 0 : index
    %c8_36 = arith.constant 8 : index
    %61 = vector.load %arg9[%c0_35, %c8_36] : memref<16x32xf32, #tpu.memory_space<vmem>>, vector<16x8xf32>
    tpu.vector_store %arg9[%c0_35, %c8_36], %60 {strides = array<i32>} : memref<16x32xf32, #tpu.memory_space<vmem>>, vector<16x8xf32>,
    %c0_37 = arith.constant 0 : index
    %c1_38 = arith.constant 1 : index
    %62 = vector.load %arg7[%c0_37, %c1_38] : memref<16x4xf32, #tpu.memory_space<vmem>>, vector<16x1xf32>
    tpu.vector_store %arg7[%c0_37, %c1_38], %44 {strides = array<i32>} : memref<16x4xf32, #tpu.memory_space<vmem>>, vector<16x1xf32>,
    %63 = vector.extract_strided_slice %10 {offsets = [0, 16], sizes = [16, 8], strides = [1, 1]} : vector<16x32xf32> to vector<16x8xf32>
    %64 = vector.extract_strided_slice %6 {offsets = [0, 16], sizes = [16, 8], strides = [1, 1]} : vector<16x32xf32> to vector<16x8xf32>
    %65 = vector.extract_strided_slice %8 {offsets = [0, 16], sizes = [16, 8], strides = [1, 1]} : vector<16x32xf32> to vector<16x8xf32>
    %cst_39 = arith.constant dense<0.000000e+00> : vector<16x16xf32>
    %66 = tpu.matmul %63, %64, %cst_39 {dimension_numbers = #tpu.dot_dimension_numbers<[1], [1], [0], [0], [0, 0, 1, 0], [], []>} : vector<16x8xf32>, vector<16x8xf32>, vector<16x16xf32> -> vector<16x16xf32>
    %c0_40 = arith.constant 0 : index
    %c2 = arith.constant 2 : index
    %67 = vector.load %arg7[%c0_40, %c2] : memref<16x4xf32, #tpu.memory_space<vmem>>, vector<16x1xf32>
    %cst_41 = arith.constant dense<0xFF800000> : vector<16xf32>
    %68 = vector.multi_reduction <maximumf>, %66, %cst_41 [1] : vector<16x16xf32> to vector<16xf32>
    %69 = vector.shape_cast %68 : vector<16xf32> to vector<16x1xf32>
    %70 = arith.maximumf %67, %69 : vector<16x1xf32>
    %71 = arith.subf %67, %70 : vector<16x1xf32>
    %72 = math.exp %71 : vector<16x1xf32>
    %73 = vector.broadcast %70 : vector<16x1xf32> to vector<16x16xf32>
    %74 = arith.subf %66, %73 : vector<16x16xf32>
    %75 = math.exp %74 : vector<16x16xf32>
    %c0_42 = arith.constant 0 : index
    %c2_43 = arith.constant 2 : index
    %76 = vector.load %arg8[%c0_42, %c2_43] : memref<16x4xf32, #tpu.memory_space<vmem>>, vector<16x1xf32>
    %77 = arith.mulf %72, %76 : vector<16x1xf32>
    %cst_44 = arith.constant dense<0.000000e+00> : vector<16xf32>
    %78 = vector.multi_reduction <add>, %75, %cst_44 [1] : vector<16x16xf32> to vector<16xf32>
    %79 = vector.shape_cast %78 : vector<16xf32> to vector<16x1xf32>
    %80 = arith.addf %77, %79 : vector<16x1xf32>
    %c0_45 = arith.constant 0 : index
    %c2_46 = arith.constant 2 : index
    %81 = vector.load %arg8[%c0_45, %c2_46] : memref<16x4xf32, #tpu.memory_space<vmem>>, vector<16x1xf32>
    tpu.vector_store %arg8[%c0_45, %c2_46], %80 {strides = array<i32>} : memref<16x4xf32, #tpu.memory_space<vmem>>, vector<16x1xf32>,
    %cst_47 = arith.constant dense<0.000000e+00> : vector<16x8xf32>
    %82 = tpu.matmul %75, %65, %cst_47 {dimension_numbers = #tpu.dot_dimension_numbers<[1], [0], [0], [1], [0, 0, 1, 1], [], []>} : vector<16x16xf32>, vector<16x8xf32>, vector<16x8xf32> -> vector<16x8xf32>
    %c0_48 = arith.constant 0 : index
    %c16 = arith.constant 16 : index
    %83 = vector.load %arg9[%c0_48, %c16] : memref<16x32xf32, #tpu.memory_space<vmem>>, vector<16x8xf32>
    %84 = vector.broadcast %72 : vector<16x1xf32> to vector<16x8xf32>
    %85 = arith.mulf %84, %83 : vector<16x8xf32>
    %86 = arith.addf %85, %82 : vector<16x8xf32>
    %c0_49 = arith.constant 0 : index
    %c16_50 = arith.constant 16 : index
    %87 = vector.load %arg9[%c0_49, %c16_50] : memref<16x32xf32, #tpu.memory_space<vmem>>, vector<16x8xf32>
    tpu.vector_store %arg9[%c0_49, %c16_50], %86 {strides = array<i32>} : memref<16x32xf32, #tpu.memory_space<vmem>>, vector<16x8xf32>,
    %c0_51 = arith.constant 0 : index
    %c2_52 = arith.constant 2 : index
    %88 = vector.load %arg7[%c0_51, %c2_52] : memref<16x4xf32, #tpu.memory_space<vmem>>, vector<16x1xf32>
    tpu.vector_store %arg7[%c0_51, %c2_52], %70 {strides = array<i32>} : memref<16x4xf32, #tpu.memory_space<vmem>>, vector<16x1xf32>,
    %89 = vector.extract_strided_slice %10 {offsets = [0, 24], sizes = [16, 8], strides = [1, 1]} : vector<16x32xf32> to vector<16x8xf32>
    %90 = vector.extract_strided_slice %6 {offsets = [0, 24], sizes = [16, 8], strides = [1, 1]} : vector<16x32xf32> to vector<16x8xf32>
    %91 = vector.extract_strided_slice %8 {offsets = [0, 24], sizes = [16, 8], strides = [1, 1]} : vector<16x32xf32> to vector<16x8xf32>
    %cst_53 = arith.constant dense<0.000000e+00> : vector<16x16xf32>
    %92 = tpu.matmul %89, %90, %cst_53 {dimension_numbers = #tpu.dot_dimension_numbers<[1], [1], [0], [0], [0, 0, 1, 0], [], []>} : vector<16x8xf32>, vector<16x8xf32>, vector<16x16xf32> -> vector<16x16xf32>
    %c0_54 = arith.constant 0 : index
    %c3 = arith.constant 3 : index
    %93 = vector.load %arg7[%c0_54, %c3] : memref<16x4xf32, #tpu.memory_space<vmem>>, vector<16x1xf32>
    %cst_55 = arith.constant dense<0xFF800000> : vector<16xf32>
    %94 = vector.multi_reduction <maximumf>, %92, %cst_55 [1] : vector<16x16xf32> to vector<16xf32>
    %95 = vector.shape_cast %94 : vector<16xf32> to vector<16x1xf32>
    %96 = arith.maximumf %93, %95 : vector<16x1xf32>
    %97 = arith.subf %93, %96 : vector<16x1xf32>
    %98 = math.exp %97 : vector<16x1xf32>
    %99 = vector.broadcast %96 : vector<16x1xf32> to vector<16x16xf32>
    %100 = arith.subf %92, %99 : vector<16x16xf32>
    %101 = math.exp %100 : vector<16x16xf32>
    %c0_56 = arith.constant 0 : index
    %c3_57 = arith.constant 3 : index
    %102 = vector.load %arg8[%c0_56, %c3_57] : memref<16x4xf32, #tpu.memory_space<vmem>>, vector<16x1xf32>
    %103 = arith.mulf %98, %102 : vector<16x1xf32>
    %cst_58 = arith.constant dense<0.000000e+00> : vector<16xf32>
    %104 = vector.multi_reduction <add>, %101, %cst_58 [1] : vector<16x16xf32> to vector<16xf32>
    %105 = vector.shape_cast %104 : vector<16xf32> to vector<16x1xf32>
    %106 = arith.addf %103, %105 : vector<16x1xf32>
    %c0_59 = arith.constant 0 : index
    %c3_60 = arith.constant 3 : index
    %107 = vector.load %arg8[%c0_59, %c3_60] : memref<16x4xf32, #tpu.memory_space<vmem>>, vector<16x1xf32>
    tpu.vector_store %arg8[%c0_59, %c3_60], %106 {strides = array<i32>} : memref<16x4xf32, #tpu.memory_space<vmem>>, vector<16x1xf32>,
    %cst_61 = arith.constant dense<0.000000e+00> : vector<16x8xf32>
    %108 = tpu.matmul %101, %91, %cst_61 {dimension_numbers = #tpu.dot_dimension_numbers<[1], [0], [0], [1], [0, 0, 1, 1], [], []>} : vector<16x16xf32>, vector<16x8xf32>, vector<16x8xf32> -> vector<16x8xf32>
    %c0_62 = arith.constant 0 : index
    %c24 = arith.constant 24 : index
    %109 = vector.load %arg9[%c0_62, %c24] : memref<16x32xf32, #tpu.memory_space<vmem>>, vector<16x8xf32>
    %110 = vector.broadcast %98 : vector<16x1xf32> to vector<16x8xf32>
    %111 = arith.mulf %110, %109 : vector<16x8xf32>
    %112 = arith.addf %111, %108 : vector<16x8xf32>
    %c0_63 = arith.constant 0 : index
    %c24_64 = arith.constant 24 : index
    %113 = vector.load %arg9[%c0_63, %c24_64] : memref<16x32xf32, #tpu.memory_space<vmem>>, vector<16x8xf32>
    tpu.vector_store %arg9[%c0_63, %c24_64], %112 {strides = array<i32>} : memref<16x32xf32, #tpu.memory_space<vmem>>, vector<16x8xf32>,
    %c0_65 = arith.constant 0 : index
    %c3_66 = arith.constant 3 : index
    %114 = vector.load %arg7[%c0_65, %c3_66] : memref<16x4xf32, #tpu.memory_space<vmem>>, vector<16x1xf32>
    tpu.vector_store %arg7[%c0_65, %c3_66], %96 {strides = array<i32>} : memref<16x4xf32, #tpu.memory_space<vmem>>, vector<16x1xf32>,
    %c0_i32_67 = arith.constant 0 : i32
    %115 = arith.cmpi eq, %arg2, %c0_i32_67 : i32
    %116 = arith.extui %115 : i1 to i32
    %c0_i32_68 = arith.constant 0 : i32
    %117 = arith.cmpi ne, %116, %c0_i32_68 : i32
    scf.if %117 {
      %c0_69 = arith.constant 0 : index
      %c0_70 = arith.constant 0 : index
      %118 = vector.load %arg8[%c0_69, %c0_70] : memref<16x4xf32, #tpu.memory_space<vmem>>, vector<16x4xf32>
      %119 = tpu.reciprocal %118 : vector<16x4xf32> -> vector<16x4xf32>
      %c0_71 = arith.constant 0 : index
      %c0_72 = arith.constant 0 : index
      %120 = vector.load %arg9[%c0_71, %c0_72] : memref<16x32xf32, #tpu.memory_space<vmem>>, vector<16x8xf32>
      %121 = vector.extract_strided_slice %119 {offsets = [0, 0], sizes = [16, 1], strides = [1, 1]} : vector<16x4xf32> to vector<16x1xf32>
      %122 = vector.broadcast %121 : vector<16x1xf32> to vector<16x8xf32>
      %123 = arith.mulf %120, %122 : vector<16x8xf32>
      %c0_73 = arith.constant 0 : index
      %c0_74 = arith.constant 0 : index
      %124 = vector.load %arg9[%c0_73, %c0_74] : memref<16x32xf32, #tpu.memory_space<vmem>>, vector<16x8xf32>
      tpu.vector_store %arg9[%c0_73, %c0_74], %123 {strides = array<i32>} : memref<16x32xf32, #tpu.memory_space<vmem>>, vector<16x8xf32>,
      %c0_75 = arith.constant 0 : index
      %c8_76 = arith.constant 8 : index
      %125 = vector.load %arg9[%c0_75, %c8_76] : memref<16x32xf32, #tpu.memory_space<vmem>>, vector<16x8xf32>
      %126 = vector.extract_strided_slice %119 {offsets = [0, 1], sizes = [16, 1], strides = [1, 1]} : vector<16x4xf32> to vector<16x1xf32>
      %127 = vector.broadcast %126 : vector<16x1xf32> to vector<16x8xf32>
      %128 = arith.mulf %125, %127 : vector<16x8xf32>
      %c0_77 = arith.constant 0 : index
      %c8_78 = arith.constant 8 : index
      %129 = vector.load %arg9[%c0_77, %c8_78] : memref<16x32xf32, #tpu.memory_space<vmem>>, vector<16x8xf32>
      tpu.vector_store %arg9[%c0_77, %c8_78], %128 {strides = array<i32>} : memref<16x32xf32, #tpu.memory_space<vmem>>, vector<16x8xf32>,
      %c0_79 = arith.constant 0 : index
      %c16_80 = arith.constant 16 : index
      %130 = vector.load %arg9[%c0_79, %c16_80] : memref<16x32xf32, #tpu.memory_space<vmem>>, vector<16x8xf32>
      %131 = vector.extract_strided_slice %119 {offsets = [0, 2], sizes = [16, 1], strides = [1, 1]} : vector<16x4xf32> to vector<16x1xf32>
      %132 = vector.broadcast %131 : vector<16x1xf32> to vector<16x8xf32>
      %133 = arith.mulf %130, %132 : vector<16x8xf32>
      %c0_81 = arith.constant 0 : index
      %c16_82 = arith.constant 16 : index
      %134 = vector.load %arg9[%c0_81, %c16_82] : memref<16x32xf32, #tpu.memory_space<vmem>>, vector<16x8xf32>
      tpu.vector_store %arg9[%c0_81, %c16_82], %133 {strides = array<i32>} : memref<16x32xf32, #tpu.memory_space<vmem>>, vector<16x8xf32>,
      %c0_83 = arith.constant 0 : index
      %c24_84 = arith.constant 24 : index
      %135 = vector.load %arg9[%c0_83, %c24_84] : memref<16x32xf32, #tpu.memory_space<vmem>>, vector<16x8xf32>
      %136 = vector.extract_strided_slice %119 {offsets = [0, 3], sizes = [16, 1], strides = [1, 1]} : vector<16x4xf32> to vector<16x1xf32>
      %137 = vector.broadcast %136 : vector<16x1xf32> to vector<16x8xf32>
      %138 = arith.mulf %135, %137 : vector<16x8xf32>
      %c0_85 = arith.constant 0 : index
      %c24_86 = arith.constant 24 : index
      %139 = vector.load %arg9[%c0_85, %c24_86] : memref<16x32xf32, #tpu.memory_space<vmem>>, vector<16x8xf32>
      tpu.vector_store %arg9[%c0_85, %c24_86], %138 {strides = array<i32>} : memref<16x32xf32, #tpu.memory_space<vmem>>, vector<16x8xf32>,
      %c0_87 = arith.constant 0 : index
      %c0_88 = arith.constant 0 : index
      %140 = vector.load %arg9[%c0_87, %c0_88] : memref<16x32xf32, #tpu.memory_space<vmem>>, vector<16x32xf32>
      %c0_89 = arith.constant 0 : index
      %c0_90 = arith.constant 0 : index
      %c0_91 = arith.constant 0 : index
      %141 = vector.load %arg6[%c0_89, %c0_90, %c0_91] : memref<1x16x32xf32, #tpu.memory_space<vmem>>, vector<1x16x32xf32>
      %142 = vector.shape_cast %141 : vector<1x16x32xf32> to vector<16x32xf32>
      %143 = vector.shape_cast %140 : vector<16x32xf32> to vector<1x16x32xf32>
      tpu.vector_store %arg6[%c0_89, %c0_90, %c0_91], %143 {strides = array<i32>} : memref<1x16x32xf32, #tpu.memory_space<vmem>>, vector<1x16x32xf32>,
    } else {
    }
    return
  }
  func.func @transform_0(%arg0: i32, %arg1: i32, %arg2: i32) -> (i32, i32, i32) {
    %c0_i32 = arith.constant 0 : i32
    %c0_i32_0 = arith.constant 0 : i32
    return %arg0, %arg1, %c0_i32 : i32, i32, i32
  }
  func.func @transform_1(%arg0: i32, %arg1: i32, %arg2: i32) -> (i32, i32, i32) {
    %c0_i32 = arith.constant 0 : i32
    %c0_i32_0 = arith.constant 0 : i32
    return %arg0, %arg2, %c0_i32 : i32, i32, i32
  }
  func.func @transform_2(%arg0: i32, %arg1: i32, %arg2: i32) -> (i32, i32, i32) {
    %c0_i32 = arith.constant 0 : i32
    %c0_i32_0 = arith.constant 0 : i32
    return %arg0, %arg2, %c0_i32 : i32, i32, i32
  }
  func.func @transform_3(%arg0: i32, %arg1: i32, %arg2: i32) -> (i32, i32, i32) {
    %c0_i32 = arith.constant 0 : i32
    %c0_i32_0 = arith.constant 0 : i32
    return %arg0, %arg1, %c0_i32 : i32, i32, i32
  }
}

</mosaic_0001>

<bundles_post_ra>
// kernel: tpu_custom_call.1
= control target key start
LH: loop header
LB: loop body
LE: loop exit
PB: predicated region body
PF: predicated region fallthrough
CT: control target
= control target key end

     0   :  { %s2677_s0 = inlined_call_operand.hbm [shape: f32[2,16,32], index: 0, kind: input, shape index: {}]   ;;  %s2678_s1 = inlined_call_operand.hbm [shape: f32[2,16,32], index: 1, kind: input, shape index: {}]   ;;  %s2679_s2 = inlined_call_operand.hbm [shape: f32[2,16,32], index: 2, kind: input, shape index: {}]   ;;  %s2680_s3 = inlined_call_operand.hbm [shape: f32[2,16,32], index: 3, kind: output, shape index: {}]  }
   0x1   :  { %2690 = sst [smem:[#allocation18_spill]] %s2678_s1 }
   0x2   :  { %8 = vsyncpa [#allocation6], 0 }
   0x3   :  { %10 = vsyncpa [#allocation6 + $0x1], 0 }
   0x4   :  { %11 = vsyncpa [#allocation9], 0 }
   0x5   :  { %13 = vsyncpa [#allocation9 + $0x1], 0 }
   0x6   :  { %14 = vsyncpa [#allocation7], 0 }
   0x7   :  { %16 = vsyncpa [#allocation7 + $0x1], 0  ;;  %s2117_s12 = smov 0   ;;  %s2119_s13 = smov 0  }
   0x8   :  { %s2121_s14 = smov 0   ;;  %s2123_s15 = smov 0  }
   0x9   :  { %s2125_s16 = smov 0   ;;  %s2127_s17 = smov 0  }
   0xa LB: > { %2691 = sst [smem:[#allocation15_spill]] %s2072_s16  ;;  %s2148_s18 = sadd.s32 4294967295, %s2076_s17   ;;  %s2076_s17 = sphi %s2127_s17, %s22_s17   ;;  %s2072_s16 = sphi %s2125_s16, %s2716_s16   ;;  %s2068_s15 = sphi %s2123_s15, %s2715_s15   ;;  %s2064_s14 = sphi %s2121_s14, %s2719_s14   ;;  %s2060_s13 = sphi %s2119_s13, %s2718_s13   ;;  %s2056_s12 = sphi %s2117_s12, %s2717_s12  }
   0xb   : > { %s1550_s19 = sadd.s32 4294967294, %s2076_s17   ;;  %s41_s20 = sadd.s32 1, %s2072_s16 }
   0xc   : > { %s50_s21 = sadd.s32 1, %s2064_s14  ;;  %p43_p0 = scmp.ge.s32.totalorder %s41_s20, 2 }
   0xd   : > { %p57_p1 = scmp.ne.s32.totalorder %s2064_s14, %s2060_s13  ;;  %p58_p2 = scmp.eq.s32.totalorder %s2076_s17, 0 }
   0xe   : > { %p63_p3 = scmp.ne.s32.totalorder %s2060_s13, %s2056_s12  ;;  %s2721_s20 = smov (%p43_p0, %s41_s20), 0 }
   0xf   : > { %2692 = sst [smem:[#allocation16_spill]] %s2721_s20  ;;  %p2160_p4 = por %p58_p2, %p57_p1 }
  0x10   : > { %p64_p5 = scmp.eq.s32.totalorder %s2148_s18, 0  ;;  %s45_s23 = ssub.s32 %s2072_s16, %s2721_s20 }
  0x11   : > { %p145_p6 = scmp.eq.s32.totalorder %s2148_s18, 1  ;;  %p48_p7 = scmp.eq.s32.totalorder %s45_s23, 0 }
  0x12   : > { %p2168_p8 = por %p64_p5, %p63_p3  ;;  %p151_p10 = scmp.eq.s32.totalorder %s1550_s19, 1 }
  0x13   : > { %p2172_p9 = por %p145_p6, %p57_p1  ;;  %p1750_p13 = scmp.lt.s32.totalorder %s2076_s17, 2 }
  0x14   : > { %s2694_s24 = scalar_select %p2168_p8, 1, 0 }
  0x15   : > { %s2695_s25 = scalar_select %p2172_p9, 1, 0 }
  0x16   : > { %s2177_s26 = scalar_select %p48_p7, %s2064_s14, %s50_s21  }
  0x17   : > { %p2179_p11 = por %p151_p10, %p63_p3  ;;  %s2683_s28 = sand.u32 1, %s2064_s14  }
  0x18   : > { %2696 = sst [smem:[#allocation17_spill]] %s2177_s26  ;;  %s2188_s29 = sshll.u32 %s2683_s28, 4 }
  0x19   : > { %s2697_s27 = scalar_select %p2179_p11, 1, 0 }
  0x1a   : > { %s2191_s30 = sshll.u32 %s2072_s16, 8  ;;  %p2195_p0 = pnand %p1750_p13, %p2160_p4 }
  0x1b   : > { %s194_s5 = sand.u32 1, %s2076_s17   ;;  %s2699_s1 = sld [smem:[#allocation18_spill]] }
  0x1c   : > { %s198_s9 = scalar_lea.vmem [#allocation8], %s2188_s29  ;;  %s2211_s11 = scalar_lea.sflag [#allocation9], %s194_s5 }
  0x1d   : > { %s207_s10 = sshll.u32 %s198_s9, 4  ;;  %p2217_p4 = pneg %p2195_p0  ;;  %s2208_s10 = int_to_ptr.vmem [resolvable:$true] %s207_s10 }
  0x21   : > { %s2204_s8 = scalar_lea.hbm %s2699_s1, %s2191_s30  ;;  %s1905_s6 = scalar_lea.hbm %s2699_s1, 512 }
  0x22   : > { %s1900_s19 = scalar_lea.hbm %s2204_s8, 256  ;;  %p1906_p7 = scmp.lt.u32.totalorder %s2204_s8, %s2699_s1 }
  0x23   : > { %p1901_p3 = scmp.ne.s32.totalorder %s2204_s8, %s1900_s19  ;;  %p1907_p10 = scmp.lt.u32.totalorder %s1905_s6, %s1900_s19 }
  0x24   : > { %p1909_p12 = scmp.lt.u32.totalorder %s1900_s19, %s2204_s8 }
  0x25   : > { %p1903_p5 = pnand %p2217_p4, %p1901_p3  ;;  %p1908_p13 = por %p1907_p10, %p1906_p7 }
  0x27   : > { %p1904_p6 = pneg %p1903_p5  ;;  %p1910_p1 = por %p1909_p12, %p1908_p13 }
  0x29   : > { %p1911_p2 = pnand %p1910_p1, %p1904_p6 }
  0x2b   : > { %1914 = shalt.err (!%p1911_p2)
}
  0x2c   : > { %s1915_s5 = scalar_lea.vmem %s2208_s10, 256  ;;  %s2078_s22 = smov [#allocation8]  }
  0x2d   : > { %p1916_p3 = scmp.ne.s32.totalorder %s2208_s10, %s1915_s5  ;;  %s1920_s23 = sshll.u32 %s2078_s22, 4  ;;  %s1921_s23 = int_to_ptr.vmem [resolvable:$false] %s1920_s23 }
  0x2e   : > { %s1922_s7 = scalar_lea.vmem %s1921_s23, 512  ;;  %p1923_p9 = scmp.lt.s32.totalorder %s2208_s10, %s1921_s23 }
  0x2f   : > { %p1918_p5 = pnand %p1916_p3, %p2217_p4  ;;  %p1924_p8 = scmp.lt.s32.totalorder %s1922_s7, %s1915_s5 }
  0x31   : > { %p1919_p11 = pneg %p1918_p5  ;;  %p1925_p7 = por %p1924_p8, %p1923_p9 }
  0x33   : > { %p1926_p10 = pnand %p1925_p7, %p1919_p11 }
  0x35   : > { %1929 = shalt.err (!%p1926_p10)
}
  0x36   : > { %s2684_s19 = smov 128   ;;  %s2686_s6 = smov 8  }
  0x37   : > { %1742 = dma.hbm_to_vmem [thread:$0]  (!%p2195_p0), %s2204_s8, 256, %s2208_s10, %s2211_s11, %s2684_s19, %s2684_s19, %s2686_s6  }
  0x38   : > { %p2701_p8 = scmp.lt.s32.totalorder %s2076_s17, 3  ;;  %p2702_p9 = scmp.ge.s32.totalorder %s2076_s17, 1 }
  0x39   : > { %s2256_s23 = scalar_lea.hbm %s2677_s0, %s2191_s30  ;;  %s175_s7 = scalar_lea.vmem [#allocation5], %s2188_s29 }
  0x3a   : > { %p2248_p11 = pnand %p2702_p9, %p2701_p8  ;;  %s184_s28 = sshll.u32 %s175_s7, 4  ;;  %s2259_s28 = int_to_ptr.vmem [resolvable:$true] %s184_s28 }
  0x3b   : > { %s2265_s19 = scalar_lea.hbm %s2679_s2, %s2191_s30  ;;  %s2704_s6 = sand.u32 1, %s2064_s14  }
  0x3c   : > { %s2703_s9 = scalar_select %p2248_p11, 1, 0 }
  0x3d   : > { %s2269_s1 = scalar_lea.sflag [#allocation6], %s2704_s6  ;;  %s1930_s20 = scalar_lea.hbm %s2256_s23, 256 }
  0x3e   : > { %p1931_p12 = scmp.ne.s32.totalorder %s2256_s23, %s1930_s20  ;;  %s1935_s16 = scalar_lea.hbm %s2677_s0, 512 }
  0x3f   : > { %p1936_p6 = scmp.lt.u32.totalorder %s2256_s23, %s2677_s0  ;;  %p1937_p13 = scmp.lt.u32.totalorder %s1935_s16, %s1930_s20 }
  0x40   : > { %p1933_p1 = pnand %p1931_p12, %p2217_p4  ;;  %p1939_p5 = scmp.lt.u32.totalorder %s1930_s20, %s2256_s23 }
  0x41   : > { %p1938_p3 = por %p1937_p13, %p1936_p6 }
  0x42   : > { %p1934_p2 = pneg %p1933_p1 }
  0x43   : > { %p1940_p7 = por %p1939_p5, %p1938_p3 }
  0x45   : > { %p1941_p10 = pnand %p1940_p7, %p1934_p2 }
  0x47   : > { %1944 = shalt.err (!%p1941_p10)
}
  0x48   : > { %s1945_s30 = scalar_lea.vmem %s2259_s28, 256  ;;  %s2081_s6 = smov [#allocation5]  }
  0x49   : > { %p1946_p8 = scmp.ne.s32.totalorder %s2259_s28, %s1945_s30  ;;  %s1950_s8 = sshll.u32 %s2081_s6, 4  ;;  %s1951_s8 = int_to_ptr.vmem [resolvable:$false] %s1950_s8 }
  0x4a   : > { %s1952_s26 = scalar_lea.vmem %s1951_s8, 512  ;;  %p1953_p1 = scmp.lt.s32.totalorder %s2259_s28, %s1951_s8 }
  0x4b   : > { %p1948_p9 = pnand %p1946_p8, %p2217_p4  ;;  %p1954_p11 = scmp.lt.s32.totalorder %s1952_s26, %s1945_s30 }
  0x4d   : > { %p1949_p12 = pneg %p1948_p9  ;;  %p1955_p6 = por %p1954_p11, %p1953_p1 }
  0x4f   : > { %p1956_p13 = pnand %p1955_p6, %p1949_p12 }
  0x51   : > { %1959 = shalt.err (!%p1956_p13)
}
  0x52   : > { %s2705_s16 = smov 8   ;;  %s2706_s20 = smov 128  }
  0x53   : > { %1739 = dma.hbm_to_vmem [thread:$0]  (!%p2195_p0), %s2256_s23, 256, %s2259_s28, %s2269_s1, %s2706_s20, %s2706_s20, %s2705_s16  }
  0x54   : > { %s221_s10 = scalar_lea.vmem [#allocation10], %s2188_s29  ;;  %s1960_s22 = scalar_lea.hbm %s2265_s19, 256 }
  0x55   : > { %s230_s5 = sshll.u32 %s221_s10, 4  ;;  %p1961_p11 = scmp.ne.s32.totalorder %s2265_s19, %s1960_s22  ;;  %s2297_s5 = int_to_ptr.vmem [resolvable:$true] %s230_s5 }
  0x56   : > { %s1965_s6 = scalar_lea.hbm %s2679_s2, 512  ;;  %p1966_p5 = scmp.lt.u32.totalorder %s2265_s19, %s2679_s2 }
  0x57   : > { %p1963_p2 = pnand %p1961_p11, %p2217_p4  ;;  %p1967_p7 = scmp.lt.u32.totalorder %s1965_s6, %s1960_s22 }
  0x58   : > { %p1969_p8 = scmp.lt.u32.totalorder %s1960_s22, %s2265_s19 }
  0x59   : > { %p1964_p3 = pneg %p1963_p2  ;;  %p1968_p10 = por %p1967_p7, %p1966_p5 }
  0x5b   : > { %p1970_p9 = por %p1969_p8, %p1968_p10 }
  0x5d   : > { %p1971_p12 = pnand %p1970_p9, %p1964_p3 }
  0x5f   : > { %1974 = shalt.err (!%p1971_p12)
}
  0x60   : > { %s1975_s1 = scalar_lea.vmem %s2297_s5, 256  ;;  %s2082_s28 = smov [#allocation10]  }
  0x61   : > { %p1976_p1 = scmp.ne.s32.totalorder %s2297_s5, %s1975_s1  ;;  %s1980_s29 = sshll.u32 %s2082_s28, 4  ;;  %s1981_s29 = int_to_ptr.vmem [resolvable:$false] %s1980_s29 }
  0x62   : > { %s1982_s23 = scalar_lea.vmem %s1981_s29, 512  ;;  %p1983_p11 = scmp.lt.s32.totalorder %s2297_s5, %s1981_s29 }
  0x63   : > { %p1978_p6 = pnand %p1976_p1, %p2217_p4  ;;  %p1984_p2 = scmp.lt.s32.totalorder %s1982_s23, %s1975_s1 }
  0x65   : > { %p1979_p13 = pneg %p1978_p6  ;;  %p1985_p5 = por %p1984_p2, %p1983_p11 }
  0x67   : > { %p1986_p7 = pnand %p1985_p5, %p1979_p13 }
  0x69   : > { %1989 = shalt.err (!%p1986_p7)
}
  0x6a   : > { %1745 = dma.hbm_to_vmem [thread:$0]  (!%p2195_p0), %s2265_s19, 256, %s2297_s5, %s2211_s11, %s2706_s20, %s2706_s20, %s2705_s16  }
  0x6b   : > { %p2707_p4 = scmp.ne.s32.totalorder %s2703_s9, 0 }
  0x6c   : > { %s2327_s21 = sand.u32 (!%p2707_p4), 1, %s2060_s13   ;;  %p2708_p3 = scmp.ne.s32.totalorder (!%p2707_p4), %s2694_s24, 0 }
  0x6d   : > { %242 = sbr.rel (%p2707_p4) target bundleno = 2574 (0xa0e), region = 32  ;;  %s2330_s10 = sshll.u32 (!%p2707_p4), %s2327_s21, 4 }
  0x6e   : > { %s245_s4 = scalar_lea.sflag (!%p2707_p4), [#allocation6], %s2327_s21  ;;  %s248_s22 = scalar_lea.vmem (!%p2707_p4), [#allocation5], %s2330_s10 }
  0x74   : > { %2043 = dma.done.wait (%p2708_p3), %s245_s4, 256  }
  0x75   : > { %2045 = vsyncadd (%p2708_p3), %s245_s4, 4294967040  ;;  %s253_s11 = sand.u32 1, %s2148_s18   ;;  %s257_s9 = scalar_lea.vmem [#allocation8], %s2330_s10 }
  0x76   : > { %s254_s19 = scalar_lea.sflag [#allocation9], %s253_s11 }
  0x77   : > { %2047 = dma.done.wait (%p2708_p3), %s254_s19, 512  }
  0x78   : > { %2049 = vsyncadd (%p2708_p3), %s254_s19, 4294966784  ;;  %vm323_vm0 = vcmask 64512   ;;  %v317_v1 = vld [vmem:[%s257_s9] sm:$0xff]  ;;  %v318_v2 = vld [vmem:[%s257_s9 + $0x8] sm:$0xff]  ;;  %vm307_vm2 = vcmask 31744   ;;  %v2083_v8 = vmov -inf  }
  0x79   : > { %vm2346_vm1 = vmpackc.low %vm323_vm0, %vm323_vm0  ;;  %v315_v3 = vld [vmem:[%s248_s22] sm:$0xff]  ;;  %v1688_v4 = vpack.c.bf16 %v318_v2, %v317_v1  ;;  %v316_v6 = vld [vmem:[%s248_s22 + $0x8] sm:$0xff]  ;;  %308 = vst.msk [vmem:[#allocation2] sm:$0xff] %vm307_vm2, %v2083_v8  ;;  %vm413_vm3 = vcmask 130048   ;;  %v2084_v13 = vmov 0   ;;  %v2367_v14 = vpack.i.bf16 %v318_v2, %v317_v1  ;;  %s2086_s18 = smov 120  }
  0x7a   : > { %v2350_v5 = vmul.f32 0.35355338, %v315_v3  ;;  %v2358_v7 = vmul.f32 0.35355338, %v316_v6  ;;  %309 = vst.msk [vmem:[#allocation2 + $0x8] sm:$0xff] %vm307_vm2, %v2083_v8  ;;  %1815 = vset.pattern.permute.xlu1 %v2084_v13  ;;  %v2085_v15 = vmov 0.0  }
  0x7b   : > { %1690 = vmatprep.subr.msk.bf16.mxu0 %vm2346_vm1, %v1688_v4  ;;  %311 = vst.msk [vmem:[#allocation3 + $0x8] sm:$0xff] %vm307_vm2, %v2085_v15  ;;  %310 = vst.msk [vmem:[#allocation3] sm:$0xff] %vm307_vm2, %v2085_v15  ;;  %vm456_vm4 = vcmask 7168   ;;  %s266_s24 = scalar_lea.vmem [#allocation10], %s2330_s10  ;;  %v2087_v47 = vmov 1   ;;  %vm695_vm5 = vcmask 15368  }
  0x7c   : > { %1636 = vmatprep.mubr.msk.f32.mxu0 %vm323_vm0, %v2350_v5  ;;  %1693 = vmatpush3.bf16.xpose.msk.msra.mxu0 %vm2346_vm1, %v1688_v4  ;;  %v319_v24 = vld [vmem:[%s266_s24] sm:$0xff]  ;;  %v320_v25 = vld [vmem:[%s266_s24 + $0x8] sm:$0xff]  ;;  %s2088_s16 = smov 112   ;;  %vm951_vm6 = vcmask 23568   ;;  %s2090_s20 = smov 104   ;;  %vm1205_vm7 = vcmask 31768  }
  0x7d   : > { %v1694_v26 = vpack.c.bf16 %v320_v25, %v319_v24  ;;  %1822 = vset.pattern.permute.xlu0 %v2087_v47  ;;  %v2442_v56 = vpack.i.bf16 %v320_v25, %v319_v24  ;;  %vm312_vm8 = vcmask 261120   ;;  %s2092_s5 = smov 16   ;;  %s2093_s7 = smov 8   ;;  %vm811_vm9 = vcmask 130112  }
  0x7e   : > { %313 = vst.msk [vmem:[#allocation4] sm:$0xff] %vm312_vm8, %v2085_v15  ;;  %314 = vst.msk [vmem:[#allocation4 + $0x8] sm:$0xff] %vm312_vm8, %v2085_v15  ;;  %vm1065_vm10 = vcmask 195712   ;;  %s2094_s30 = smov 24   ;;  %vm1319_vm11 = vcmask 261312   ;;  %s1599_s6 = sshll.u32 %s2068_s15, 8 }
  0x7f   : > { %1695 = vmatprep.subr.bf16.mxu1 %v1694_v26  ;;  %s298_s8 = scalar_lea.vmem [#allocation11], %s2330_s10  ;;  %s2624_s29 = scalar_lea.hbm %s2680_s3, %s1599_s6 }
  0x80   : > { %v2375_v16 = vld [vmem:[#allocation2] sm:$0xff]  ;;  %1697 = vmatpush3.bf16.msra.mxu1 %v1694_v26  ;;  %s1410_s26 = sshll.u32 %s298_s8, 4  ;;  %s1395_s23 = scalar_lea.sflag [#allocation7], %s2327_s21  ;;  %s2626_s26 = int_to_ptr.vmem [resolvable:$true] %s1410_s26 }
  0x81   : > { %v2380_v19 = vld [vmem:[#allocation2 + $0x8] sm:$0xff]  ;;  %s1990_s4 = scalar_lea.vmem %s2626_s26, 256  ;;  %p2711_p10 = scmp.ne.s32.totalorder %s2695_s25, 0 }
  0x82   : > { %p1991_p0 = scmp.ne.s32.totalorder %s2626_s26, %s1990_s4  ;;  %s2095_s15 = smov [#allocation11]  }
  0x83   : > { %1637 = vmatmul.mubr.msk.f32.vlgmr.msra.gmra.mrb[0].mxu0 %vm323_vm0, %v2358_v7  ;;  %s1994_s10 = sshll.u32 %s2095_s15, 4  ;;  %s1995_s10 = int_to_ptr.vmem [resolvable:$false] %s1994_s10 }
  0x84   : > { %p1992_p8 = pnand %p1991_p0, %p2711_p10  ;;  %s1996_s22 = scalar_lea.vmem %s1995_s10, 512 }
  0x85   : > { %p1997_p12 = scmp.lt.s32.totalorder %s2626_s26, %s1995_s10  ;;  %p1998_p1 = scmp.lt.s32.totalorder %s1996_s22, %s1990_s4 }
  0x86   : > { %p1993_p9 = pneg %p1992_p8 }
  0x87   : > { %p1999_p6 = por %p1998_p1, %p1997_p12 }
  0x89   : > { %p2000_p13 = pnand %p1999_p6, %p1993_p9 }
 0x156   : > { %v1638_v9 = vpop.f32.mrb[0].mxu0 }
 0x157   : > { %v402_v10 = vpop.f32.mrb[1].mxu0  ;;  %v417_v12 = vsel %vm413_vm3, %v1638_v9, -inf }
 0x158   : > { %v414_v11 = vsel %vm413_vm3, %v402_v10, -inf }
 0x159   : > { %415 = vmax.xlane.f32.xlu0 %v414_v11 }
 0x15d   : > { %418 = vmax.xlane.f32.xlu0 %v417_v12 }
 0x173   : > { %1817 = vrot.lane.b32.xlu0 %v2367_v14, %s2086_s18 }
 0x1e6   : > { %v416_v17 = vpop.xlane.xlu0 %415 }
 0x1e7   : > { %v2378_v18 = vmax.f32 %v2375_v16, %v416_v17 }
 0x1e9   : > { %v422_v20 = vsub.f32 %v2375_v16, %v2378_v18  ;;  %558 = vst.msk [vmem:[#allocation2] sm:$0xff] %vm456_vm4, %v2378_v18  ;;  %430 = vperm.xlu1 %1815, %v2378_v18  }
 0x1ea   : > { %v419_v21 = vpop.xlane.xlu0 %418 }
 0x1eb   : > { %v2388_v22 = vmax.f32 %v2380_v19, %v419_v21 }
 0x1ed   : > { %v423_v23 = vsub.f32 %v2380_v19, %v2388_v22  ;;  %559 = vst.msk [vmem:[#allocation2 + $0x8] sm:$0xff] %vm456_vm4, %v2388_v22  ;;  %435 = vperm.xlu1 %1815, %v2388_v22  }
 0x1ee   : > { %v1818_v27 = vpop.permute.xlu0 %1817 }
 0x1ef   : > { %v1820_v28 = vunpack.i.h.bf16 %v1818_v27  ;;  %v1819_v29 = vunpack.i.l.bf16 %v1818_v27 }
 0x1f0   : > { %v2427_v52 = vld [vmem:[#allocation2] sm:$0xff] }
 0x1f1   : > { %560 = vrot.lane.b32.xlu1 %v2350_v5, %s2086_s18  ;;  %v1698_v30 = vpack.c.bf16 %v1820_v28, %v1819_v29  ;;  %v2089_v29 = vmov 2  }
 0x1f2   : > { %1821 = vset.pattern.permute.xlu1 %v2087_v47 }
 0x1f3   : > { %1700 = vmatprep.subr.msk.bf16.mxu1 %vm2346_vm1, %v1698_v30 }
 0x1f4   : > { %v2422_v48 = vld [vmem:[#allocation2 + $0x8] sm:$0xff] }
 0x1f5   : > { %562 = vrot.lane.b32.xlu1 %v2358_v7, %s2086_s18 }
 0x268   : > { %v431_v31 = vpop.permute.xlu1 %430 }
 0x269   : > { %v438_v32 = vsub.f32 %v402_v10, %v431_v31 }
 0x26b   : > { %v440_v33 = vmul.f32 1.442695, %v438_v32 }
 0x26c   : > { %v436_v34 = vpop.permute.xlu1 %435 }
 0x26d   : > { %1864 = vpow2.f32 %v440_v33  ;;  %v439_v35 = vsub.f32 %v1638_v9, %v436_v34 }
 0x26f   : > { %v442_v36 = vmul.f32 1.442695, %v439_v35 }
 0x270   : > { %v561_v38 = vpop.permute.xlu1 %560 }
 0x271   : > { %1866 = vpow2.f32 %v442_v36 }
 0x274   : > { %v563_v40 = vpop.permute.xlu1 %562 }
 0x277   : > { %v2402_v37 = vpop.eup %1864 }
 0x278   : > { %1643 = vmatprep.mubr.msk.f32.mxu1 %vm413_vm3, %v2402_v37 }
 0x27b   : > { %v2406_v39 = vpop.eup %1866 }
 0x27c   : > { %1644 = vmatmul.mubr.msk.f32.vlgmr.msra.gmra.mrb[0].mxu1 %vm413_vm3, %v2406_v39  ;;  %v451_v0 = vsel %vm413_vm3, %v2406_v39, 0.0 }
 0x27d   : > { %1703 = vmatpush3.bf16.xpose.msk.msra.mxu1 %vm2346_vm1, %v1698_v30  ;;  %1650 = vmatprep.mubr.msk.f32.mxu1 %vm323_vm0, %v561_v38 }
 0x284   : > { %1651 = vmatmul.mubr.msk.f32.vlgmr.msra.gmra.mrb[2].mxu1 %vm323_vm0, %v563_v40 }
 0x34f   : > { %v2414_v41 = vpop.f32.mrb[0].mxu1 }
 0x350   : > { %v2416_v42 = vpop.f32.mrb[1].mxu1 }
 0x357   : > { %v1652_v43 = vpop.f32.mrb[2].mxu1 }
 0x358   : > { %v642_v44 = vpop.f32.mrb[3].mxu1  ;;  %v656_v45 = vsel %vm413_vm3, %v1652_v43, -inf }
 0x359   : > { %657 = vmax.xlane.f32.xlu0 %v656_v45  ;;  %v653_v46 = vsel %vm413_vm3, %v642_v44, -inf }
 0x35a   : > { %654 = vmax.xlane.f32.xlu1 %v653_v46 }
 0x3e6   : > { %v658_v49 = vpop.xlane.xlu0 %657 }
 0x3e7   : > { %v2425_v50 = vmax.f32 %v2422_v48, %v658_v49  ;;  %v655_v51 = vpop.xlane.xlu1 %654 }
 0x3e8   : > { %v2430_v53 = vmax.f32 %v2427_v52, %v655_v51 }
 0x3e9   : > { %v662_v54 = vsub.f32 %v2422_v48, %v2425_v50  ;;  %815 = vst.msk [vmem:[#allocation2 + $0x8] sm:$0xff] %vm695_vm5, %v2425_v50  ;;  %674 = vperm.xlu0 %1822, %v2425_v50   ;;  %v444_v50 = vld [vmem:[#allocation3] sm:$0xff] }
 0x3ea   : > { %v661_v55 = vsub.f32 %v2427_v52, %v2430_v53  ;;  %814 = vst.msk [vmem:[#allocation2] sm:$0xff] %vm695_vm5, %v2430_v53  ;;  %669 = vperm.xlu1 %1821, %v2430_v53  }
 0x3eb   : > { %v665_v16 = vmul.f32 1.442695, %v662_v54 }
 0x3ed   : > { %1834 = vset.pattern.permute.xlu0 %v2089_v29 }
 0x3ee   : > { %1824 = vrot.lane.b32.xlu1 %v2442_v56, %s2086_s18 }
 0x3ef   : > { %1833 = vset.pattern.permute.xlu1 %v2089_v29 }
 0x3f0   : > { %v2474_v30 = vld [vmem:[#allocation2 + $0x8] sm:$0xff] }
 0x3f1   : > { %v2479_v34 = vld [vmem:[#allocation2] sm:$0xff] }
 0x3f2   : > { %1829 = vrot.lane.b32.xlu1 %v2367_v14, %s2088_s16 }
 0x3f6   : > { %816 = vrot.lane.b32.xlu1 %v2350_v5, %s2088_s16 }
 0x3fa   : > { %818 = vrot.lane.b32.xlu1 %v2358_v7, %s2088_s16 }
 0x468   : > { %v675_v57 = vpop.permute.xlu0 %674 }
 0x469   : > { %v678_v58 = vsub.f32 %v1652_v43, %v675_v57  ;;  %v670_v59 = vpop.permute.xlu1 %669 }
 0x46a   : > { %v677_v60 = vsub.f32 %v642_v44, %v670_v59 }
 0x46b   : > { %v681_v61 = vmul.f32 1.442695, %v678_v58 }
 0x46c   : > { %v679_v62 = vmul.f32 1.442695, %v677_v60 }
 0x46d   : > { %v1825_v63 = vpop.permute.xlu1 %1824 }
 0x46e   : > { %1868 = vpow2.f32 %v679_v62  ;;  %v1827_v1 = vunpack.i.h.bf16 %v1825_v63  ;;  %v1826_v2 = vunpack.i.l.bf16 %v1825_v63 }
 0x46f   : > { %1870 = vpow2.f32 %v681_v61 }
 0x470   : > { %v1704_v3 = vpack.c.bf16 %v1827_v1, %v1826_v2 }
 0x471   : > { %v1830_v4 = vpop.permute.xlu1 %1829 }
 0x472   : > { %1705 = vmatprep.subr.bf16.mxu0 %v1704_v3  ;;  %v1832_v6 = vunpack.i.h.bf16 %v1830_v4  ;;  %v1831_v8 = vunpack.i.l.bf16 %v1830_v4 }
 0x473   : > { %1707 = vmatpush3.bf16.msra.mxu0 %v1704_v3 }
 0x474   : > { %v1708_v9 = vpack.c.bf16 %v1832_v6, %v1831_v8 }
 0x475   : > { %v817_v11 = vpop.permute.xlu1 %816 }
 0x476   : > { %1710 = vmatprep.subr.msk.bf16.mxu0 %vm2346_vm1, %v1708_v9 }
 0x478   : > { %v2454_v10 = vpop.eup %1868 }
 0x479   : > { %v2456_v12 = vpop.eup %1870  ;;  %1657 = vmatprep.mubr.msk.f32.mxu0 %vm413_vm3, %v2454_v10  ;;  %v819_v17 = vpop.permute.xlu1 %818 }
 0x47a   : > { %1658 = vmatmul.mubr.msk.f32.vlgmr.msra.gmra.mrb[2].mxu0 %vm413_vm3, %v2456_v12 }
 0x47b   : > { %1664 = vmatprep.mubr.msk.f32.mxu0 %vm323_vm0, %v817_v11  ;;  %v2091_v11 = vmov 3  }
 0x47c   : > { %1713 = vmatpush3.bf16.xpose.msk.msra.mxu0 %vm2346_vm1, %v1708_v9 }
 0x483   : > { %1665 = vmatmul.mubr.msk.f32.vlgmr.msra.gmra.mrb[4].mxu0 %vm323_vm0, %v819_v17 }
 0x54d   : > { %v2466_v21 = vpop.f32.mrb[2].mxu0 }
 0x54e   : > { %v2468_v24 = vpop.f32.mrb[3].mxu0 }
 0x556   : > { %v1666_v25 = vpop.f32.mrb[4].mxu0 }
 0x557   : > { %v898_v26 = vpop.f32.mrb[5].mxu0  ;;  %v912_v27 = vsel %vm413_vm3, %v1666_v25, -inf }
 0x558   : > { %913 = vmax.xlane.f32.xlu0 %v912_v27  ;;  %v909_v28 = vsel %vm413_vm3, %v898_v26, -inf }
 0x559   : > { %910 = vmax.xlane.f32.xlu1 %v909_v28 }
 0x5e5   : > { %v914_v31 = vpop.xlane.xlu0 %913 }
 0x5e6   : > { %v2477_v32 = vmax.f32 %v2474_v30, %v914_v31  ;;  %v911_v33 = vpop.xlane.xlu1 %910 }
 0x5e7   : > { %v2482_v35 = vmax.f32 %v2479_v34, %v911_v33 }
 0x5e8   : > { %v918_v36 = vsub.f32 %v2474_v30, %v2477_v32  ;;  %1069 = vst.msk [vmem:[#allocation2 + $0x8] sm:$0xff] %vm951_vm6, %v2477_v32  ;;  %930 = vperm.xlu0 %1834, %v2477_v32  }
 0x5e9   : > { %v917_v38 = vsub.f32 %v2479_v34, %v2482_v35  ;;  %1068 = vst.msk [vmem:[#allocation2] sm:$0xff] %vm951_vm6, %v2482_v35  ;;  %925 = vperm.xlu1 %1833, %v2482_v35  }
 0x5ea   : > { %v921_v15 = vmul.f32 1.442695, %v918_v36 }
 0x5eb   : > { %v919_v52 = vmul.f32 1.442695, %v917_v38 }
 0x5ec   : > { %1852 = vset.pattern.permute.xlu0 %v2084_v13 }
 0x5ed   : > { %1836 = vrot.lane.b32.xlu1 %v2442_v56, %s2088_s16 }
 0x5ee   : > { %1845 = vset.pattern.permute.xlu1 %v2091_v11 }
 0x5ef   : > { %v2522_v17 = vld [vmem:[#allocation2 + $0x8] sm:$0xff] }
 0x5f0   : > { %v2525_v28 = vld [vmem:[#allocation2] sm:$0xff] }
 0x5f1   : > { %1841 = vrot.lane.b32.xlu1 %v2367_v14, %s2090_s20 }
 0x5f5   : > { %1070 = vrot.lane.b32.xlu1 %v2350_v5, %s2090_s20 }
 0x5f9   : > { %1072 = vrot.lane.b32.xlu1 %v2358_v7, %s2090_s20 }
 0x667   : > { %v931_v40 = vpop.permute.xlu0 %930 }
 0x668   : > { %v934_v43 = vsub.f32 %v1666_v25, %v931_v40  ;;  %v926_v44 = vpop.permute.xlu1 %925 }
 0x669   : > { %v933_v45 = vsub.f32 %v898_v26, %v926_v44 }
 0x66a   : > { %v937_v46 = vmul.f32 1.442695, %v934_v43 }
 0x66b   : > { %v935_v49 = vmul.f32 1.442695, %v933_v45  ;;  %v426_v45 = vmul.f32 1.442695, %v423_v23 }
 0x66c   : > { %v1837_v51 = vpop.permute.xlu1 %1836 }
 0x66d   : > { %1872 = vpow2.f32 %v935_v49  ;;  %v1839_v57 = vunpack.i.h.bf16 %v1837_v51  ;;  %v1838_v58 = vunpack.i.l.bf16 %v1837_v51  ;;  %v687_v49 = vsel %vm413_vm3, %v2454_v10, 0.0 }
 0x66e   : > { %1874 = vpow2.f32 %v937_v46  ;;  %v448_v46 = vsel %vm413_vm3, %v2402_v37, 0.0 }
 0x66f   : > { %v1714_v59 = vpack.c.bf16 %v1839_v57, %v1838_v58  ;;  %1876 = vpow2.f32 %v426_v45  ;;  %v445_v57 = vld [vmem:[#allocation3 + $0x8] sm:$0xff]  ;;  %v690_v58 = vsel %vm413_vm3, %v2456_v12, 0.0 }
 0x670   : > { %v1842_v60 = vpop.permute.xlu1 %1841 }
 0x671   : > { %1715 = vmatprep.subr.bf16.mxu1 %v1714_v59  ;;  %v1844_v14 = vunpack.i.h.bf16 %v1842_v60  ;;  %v1843_v61 = vunpack.i.l.bf16 %v1842_v60 }
 0x672   : > { %1717 = vmatpush3.bf16.msra.mxu1 %v1714_v59 }
 0x673   : > { %v1718_v5 = vpack.c.bf16 %v1844_v14, %v1843_v61 }
 0x674   : > { %v1071_v62 = vpop.permute.xlu1 %1070 }
 0x675   : > { %1720 = vmatprep.subr.msk.bf16.mxu1 %vm2346_vm1, %v1718_v5 }
 0x677   : > { %v1873_v7 = vpop.eup %1872 }
 0x678   : > { %v1875_v63 = vpop.eup %1874  ;;  %1671 = vmatprep.mubr.msk.f32.mxu1 %vm413_vm3, %v1873_v7  ;;  %v1073_v1 = vpop.permute.xlu1 %1072  ;;  %v943_v19 = vsel %vm413_vm3, %v1873_v7, 0.0 }
 0x679   : > { %1672 = vmatmul.mubr.msk.f32.vlgmr.msra.gmra.mrb[4].mxu1 %vm413_vm3, %v1875_v63  ;;  %v1877_v51 = vpop.eup %1876  ;;  %v946_v22 = vsel %vm413_vm3, %v1875_v63, 0.0  ;;  %v424_v63 = vmul.f32 1.442695, %v422_v20 }
 0x67a   : > { %1678 = vmatprep.mubr.msk.f32.mxu1 %vm323_vm0, %v1071_v62  ;;  %v447_v59 = vmul.f32 %v1877_v51, %v445_v57 }
 0x67b   : > { %1723 = vmatpush3.bf16.xpose.msk.msra.mxu1 %vm2346_vm1, %v1718_v5 }
 0x682   : > { %1679 = vmatmul.mubr.msk.f32.vlgmr.msra.gmra.mrb[6].mxu1 %vm323_vm0, %v1073_v1 }
 0x74c   : > { %v2511_v2 = vpop.f32.mrb[4].mxu1 }
 0x74d   : > { %v2513_v3 = vpop.f32.mrb[5].mxu1 }
 0x755   : > { %v1680_v4 = vpop.f32.mrb[6].mxu1 }
 0x756   : > { %v1152_v6 = vpop.f32.mrb[7].mxu1  ;;  %v1166_v8 = vsel %vm413_vm3, %v1680_v4, -inf }
 0x757   : > { %1167 = vmax.xlane.f32.xlu0 %v1166_v8  ;;  %v1163_v9 = vsel %vm413_vm3, %v1152_v6, -inf }
 0x758   : > { %1164 = vmax.xlane.f32.xlu1 %v1163_v9 }
 0x76d   : > { %1847 = vrot.lane.b32.xlu0 %v2442_v56, %s2090_s20 }
 0x78c   : > { %452 = vadd.xlane.f32.xlu0 %v451_v0 }
 0x7e4   : > { %v1168_v25 = vpop.xlane.xlu0 %1167 }
 0x7e5   : > { %v1170_v26 = vmax.f32 %v2522_v17, %v1168_v25  ;;  %v1165_v27 = vpop.xlane.xlu1 %1164 }
 0x7e6   : > { %v2528_v31 = vmax.f32 %v2525_v28, %v1165_v27 }
 0x7e7   : > { %v1172_v33 = vsub.f32 %v2522_v17, %v1170_v26  ;;  %1323 = vst.msk [vmem:[#allocation2 + $0x8] sm:$0xff] %vm1205_vm7, %v1170_v26 }
 0x7e8   : > { %v1171_v39 = vsub.f32 %v2525_v28, %v2528_v31  ;;  %1322 = vst.msk [vmem:[#allocation2] sm:$0xff] %vm1205_vm7, %v2528_v31  ;;  %1179 = vperm.xlu1 %1845, %v2528_v31   ;;  %v1848_v56 = vpop.permute.xlu0 %1847 }
 0x7e9   : > { %v1850_v40 = vunpack.i.h.bf16 %v1848_v56  ;;  %v1849_v43 = vunpack.i.l.bf16 %v1848_v56  ;;  %v1175_v20 = vmul.f32 1.442695, %v1172_v33 }
 0x7ea   : > { %v1173_v54 = vmul.f32 1.442695, %v1171_v39 }
 0x7eb   : > { %v1724_v44 = vpack.c.bf16 %v1850_v40, %v1849_v43 }
 0x7ec   : > { %1184 = vperm.xlu1 %1845, %v1170_v26  }
 0x7ed   : > { %1725 = vmatprep.subr.bf16.mxu0 %v1724_v44 }
 0x7ee   : > { %1727 = vmatpush3.bf16.msra.mxu0 %v1724_v44 }
 0x7f0   : > { %1851 = vset.pattern.permute.xlu1 %v2084_v13 }
 0x810   : > { %449 = vadd.xlane.f32.xlu1 %v448_v46 }
 0x814   : > { %688 = vadd.xlane.f32.xlu1 %v687_v49  ;;  %v540_v49 = vld [vmem:[#allocation4] sm:$0xff] }
 0x818   : > { %691 = vadd.xlane.f32.xlu1 %v690_v58 }
 0x819   : > { %v453_v60 = vpop.xlane.xlu0 %452 }
 0x81a   : > { %v455_v14 = vadd.f32 %v453_v60, %v447_v59 }
 0x81c   : > { %458 = vst.msk [vmem:[#allocation3 + $0x8] sm:$0xff] %vm456_vm4, %v455_v14  ;;  %944 = vadd.xlane.f32.xlu1 %v943_v19 }
 0x820   : > { %947 = vadd.xlane.f32.xlu1 %v946_v22  ;;  %v541_v22 = vld [vmem:[#allocation4 + $0x8] sm:$0xff] }
 0x823   : > { %v684_v36 = vld [vmem:[#allocation3 + $0x8] sm:$0xff] }
 0x867   : > { %v1180_v23 = vpop.permute.xlu1 %1179 }
 0x868   : > { %v1187_v37 = vsub.f32 %v1152_v6, %v1180_v23 }
 0x86a   : > { %v1189_v10 = vmul.f32 1.442695, %v1187_v37 }
 0x86b   : > { %v1185_v61 = vpop.permute.xlu1 %1184 }
 0x86c   : > { %1878 = vpow2.f32 %v1189_v10  ;;  %v1188_v5 = vsub.f32 %v1680_v4, %v1185_v61  ;;  %v663_v4 = vmul.f32 1.442695, %v661_v55 }
 0x86e   : > { %v1191_v62 = vmul.f32 1.442695, %v1188_v5 }
 0x870   : > { %1880 = vpow2.f32 %v1191_v62 }
 0x871   : > { %1882 = vpow2.f32 %v424_v63 }
 0x872   : > { %1884 = vpow2.f32 %v663_v4 }
 0x873   : > { %1886 = vpow2.f32 %v665_v16 }
 0x874   : > { %1888 = vpow2.f32 %v1175_v20 }
 0x875   : > { %1890 = vpow2.f32 %v919_v52 }
 0x876   : > { %v1879_v12 = vpop.eup %1878  ;;  %1892 = vpow2.f32 %v921_v15 }
 0x877   : > { %1685 = vmatprep.mubr.msk.f32.mxu0 %vm413_vm3, %v1879_v12  ;;  %v1197_v1 = vsel %vm413_vm3, %v1879_v12, 0.0  ;;  %1894 = vpow2.f32 %v1173_v54 }
 0x878   : > { %1198 = vadd.xlane.f32.xlu1 %v1197_v1 }
 0x87a   : > { %v1881_v7 = vpop.eup %1880 }
 0x87b   : > { %1686 = vmatmul.mubr.msk.f32.vlgmr.msra.gmra.mrb[6].mxu0 %vm413_vm3, %v1881_v7  ;;  %v1200_v6 = vsel %vm413_vm3, %v1881_v7, 0.0  ;;  %v1883_v18 = vpop.eup %1882 }
 0x87c   : > { %1201 = vadd.xlane.f32.xlu0 %v1200_v6  ;;  %v1885_v8 = vpop.eup %1884  ;;  %v446_v55 = vmul.f32 %v1883_v18, %v444_v50 }
 0x87d   : > { %v1887_v53 = vpop.eup %1886 }
 0x87e   : > { %v1889_v48 = vpop.eup %1888  ;;  %v686_v38 = vmul.f32 %v1887_v53, %v684_v36 }
 0x87f   : > { %v1891_v30 = vpop.eup %1890 }
 0x889   : > { %544 = vperm.xlu1 %1851, %v1883_v18  }
 0x88d   : > { %1853 = vset.pattern.permute.xlu1 %v2087_v47 }
 0x88e   : > { %791 = vperm.xlu1 %1853, %v1885_v8  }
 0x892   : > { %549 = vperm.xlu0 %1852, %v1877_v51   ;;  %796 = vperm.xlu1 %1853, %v1887_v53  }
 0x896   : > { %1059 = vrot.lane.b32.xlu0 %v2511_v2, %s2092_s5  ;;  %803 = vrot.lane.b32.xlu1 %v2468_v24, %s2093_s7  ;;  %v1893_v24 = vpop.eup %1892 }
 0x897   : > { %1856 = vset.pattern.permute.xlu0 %v2091_v11  ;;  %1854 = vset.pattern.permute.xlu1 %v2089_v29  ;;  %v1895_v17 = vpop.eup %1894 }
 0x89a   : > { %1304 = vperm.xlu0 %1856, %v1889_v48   ;;  %805 = vrot.lane.b32.xlu1 %v2466_v21, %s2093_s7 }
 0x89d   : > { %v450_v32 = vpop.xlane.xlu1 %449 }
 0x89e   : > { %v454_v34 = vadd.f32 %v450_v32, %v446_v55  ;;  %1045 = vperm.xlu1 %1854, %v1891_v30   ;;  %1857 = vset.pattern.permute.xlu0 %v2084_v13 }
 0x8a0   : > { %457 = vst.msk [vmem:[#allocation3] sm:$0xff] %vm456_vm4, %v454_v34 }
 0x8a1   : > { %v689_v35 = vpop.xlane.xlu1 %688 }
 0x8a2   : > { %1050 = vperm.xlu1 %1854, %v1893_v24  }
 0x8a5   : > { %v692_v21 = vpop.xlane.xlu1 %691 }
 0x8a6   : > { %v694_v2 = vadd.f32 %v692_v21, %v686_v38  ;;  %1057 = vrot.lane.b32.xlu1 %v2513_v3, %s2092_s5 }
 0x8a7   : > { %v683_v9 = vld [vmem:[#allocation3] sm:$0xff]  ;;  %1855 = vset.pattern.permute.xlu1 %v2091_v11 }
 0x8a8   : > { %v685_v0 = vmul.f32 %v1885_v8, %v683_v9  ;;  %697 = vst.msk [vmem:[#allocation3 + $0x8] sm:$0xff] %vm695_vm5, %v694_v2 }
 0x8a9   : > { %v945_v26 = vpop.xlane.xlu1 %944 }
 0x8aa   : > { %v693_v25 = vadd.f32 %v689_v35, %v685_v0  ;;  %1299 = vperm.xlu1 %1855, %v1895_v17  }
 0x8ac   : > { %696 = vst.msk [vmem:[#allocation3] sm:$0xff] %vm695_vm5, %v693_v25 }
 0x8ad   : > { %v948_v31 = vpop.xlane.xlu1 %947 }
 0x8ae   : > { %1858 = vset.pattern.permute.xlu1 %v2084_v13 }
 0x8af   : > { %v940_v27 = vld [vmem:[#allocation3 + $0x8] sm:$0xff] }
 0x8b0   : > { %v942_v28 = vmul.f32 %v1893_v24, %v940_v27 }
 0x8b2   : > { %v950_v33 = vadd.f32 %v948_v31, %v942_v28 }
 0x8b3   : > { %v939_v39 = vld [vmem:[#allocation3] sm:$0xff] }
 0x8b4   : > { %v941_v3 = vmul.f32 %v1891_v30, %v939_v39  ;;  %953 = vst.msk [vmem:[#allocation3 + $0x8] sm:$0xff] %vm951_vm6, %v950_v33 }
 0x8b6   : > { %v949_v56 = vadd.f32 %v945_v26, %v941_v3 }
 0x8b8   : > { %952 = vst.msk [vmem:[#allocation3] sm:$0xff] %vm951_vm6, %v949_v56 }
 0x8bb   : > { %v1194_v45 = vld [vmem:[#allocation3 + $0x8] sm:$0xff] }
 0x8bc   : > { %v1196_v13 = vmul.f32 %v1889_v48, %v1194_v45 }
 0x8bf   : > { %v1193_v40 = vld [vmem:[#allocation3] sm:$0xff] }
 0x8c0   : > { %v1195_v43 = vmul.f32 %v1895_v17, %v1193_v40 }
 0x905   : > { %v1199_v44 = vpop.xlane.xlu1 %1198 }
 0x906   : > { %v1203_v46 = vadd.f32 %v1199_v44, %v1195_v43 }
 0x908   : > { %1206 = vst.msk [vmem:[#allocation3] sm:$0xff] %vm1205_vm7, %v1203_v46 }
 0x909   : > { %v1202_v51 = vpop.xlane.xlu0 %1201  ;;  %v545_v57 = vpop.permute.xlu1 %544 }
 0x90a   : > { %v1204_v58 = vadd.f32 %v1202_v51, %v1196_v13  ;;  %v552_v59 = vmul.f32 %v545_v57, %v540_v49 }
 0x90c   : > { %1207 = vst.msk [vmem:[#allocation3 + $0x8] sm:$0xff] %vm1205_vm7, %v1204_v58  ;;  %v554_v60 = vadd.f32 %v552_v59, %v2416_v42 }
 0x90d   : > { %v792_v14 = vpop.permute.xlu1 %791 }
 0x90e   : > { %556 = vst.msk [vmem:[#allocation4] sm:$0xff] %vm323_vm0, %v554_v60 }
 0x90f   : > { %v1327_v19 = vld [vmem:[#allocation3] sm:$0xff] }
 0x910   : > { %1896 = vrcp.f32 %v1327_v19 }
 0x911   : > { %v550_v23 = vpop.permute.xlu0 %549  ;;  %v797_v37 = vpop.permute.xlu1 %796 }
 0x912   : > { %v553_v10 = vmul.f32 %v550_v23, %v541_v22 }
 0x913   : > { %v1328_v61 = vld [vmem:[#allocation3 + $0x8] sm:$0xff] }
 0x914   : > { %1898 = vrcp.f32 %v1328_v61  ;;  %v555_v5 = vadd.f32 %v2414_v41, %v553_v10 }
 0x915   : > { %v787_v62 = vld [vmem:[#allocation4] sm:$0xff]  ;;  %v804_v12 = vpop.permute.xlu1 %803  ;;  %v1060_v54 = vpop.permute.xlu0 %1059 }
 0x916   : > { %v799_v1 = vmul.f32 %v792_v14, %v787_v62  ;;  %557 = vst.msk [vmem:[#allocation4 + $0x8] sm:$0xff] %vm323_vm0, %v555_v5 }
 0x918   : > { %v809_v42 = vadd.f32 %v804_v12, %v799_v1 }
 0x919   : > { %v806_v7 = vpop.permute.xlu1 %805  ;;  %v1305_v35 = vpop.permute.xlu0 %1304 }
 0x91a   : > { %v1897_v63 = vpop.eup %1896  ;;  %812 = vst.msk [vmem:[#allocation4] sm:$0xff] %vm811_vm9, %v809_v42 }
 0x91b   : > { %1335 = vperm.xlu0 %1857, %v1897_v63  }
 0x91d   : > { %v788_v6 = vld [vmem:[#allocation4 + $0x8] sm:$0xff]  ;;  %v1046_v4 = vpop.permute.xlu1 %1045 }
 0x91e   : > { %v1899_v16 = vpop.eup %1898  ;;  %v800_v18 = vmul.f32 %v797_v37, %v788_v6 }
 0x91f   : > { %1860 = vset.pattern.permute.xlu0 %v2087_v47 }
 0x920   : > { %v810_v20 = vadd.f32 %v806_v7, %v800_v18  ;;  %1354 = vperm.xlu0 %1860, %v1899_v16  }
 0x921   : > { %v1041_v41 = vld [vmem:[#allocation4] sm:$0xff]  ;;  %v1051_v8 = vpop.permute.xlu1 %1050 }
 0x922   : > { %813 = vst.msk [vmem:[#allocation4 + $0x8] sm:$0xff] %vm811_vm9, %v810_v20  ;;  %v1053_v52 = vmul.f32 %v1046_v4, %v1041_v41 }
 0x924   : > { %1862 = vset.pattern.permute.xlu0 %v2091_v11 }
 0x925   : > { %v1058_v53 = vpop.permute.xlu1 %1057  ;;  %1378 = vperm.xlu0 %1862, %v1897_v63  }
 0x926   : > { %v1063_v15 = vadd.f32 %v1058_v53, %v1053_v52 }
 0x928   : > { %1066 = vst.msk [vmem:[#allocation4] sm:$0xff] %vm1065_vm10, %v1063_v15 }
 0x929   : > { %v1042_v48 = vld [vmem:[#allocation4 + $0x8] sm:$0xff]  ;;  %v1300_v34 = vpop.permute.xlu1 %1299 }
 0x92a   : > { %v1054_v50 = vmul.f32 %v1051_v8, %v1042_v48 }
 0x92c   : > { %v1064_v55 = vadd.f32 %v1060_v54, %v1054_v50 }
 0x92e   : > { %1067 = vst.msk [vmem:[#allocation4 + $0x8] sm:$0xff] %vm1065_vm10, %v1064_v55 }
 0x92f   : > { %v1295_v38 = vld [vmem:[#allocation4] sm:$0xff] }
 0x930   : > { %v1307_v9 = vmul.f32 %v1300_v34, %v1295_v38 }
 0x935   : > { %v1296_v24 = vld [vmem:[#allocation4 + $0x8] sm:$0xff] }
 0x936   : > { %v1308_v36 = vmul.f32 %v1305_v35, %v1296_v24 }
 0x94e   : > { %v1687_v30 = vpop.f32.mrb[6].mxu0 }
 0x94f   : > { %v1286_v32 = vpop.f32.mrb[7].mxu0  ;;  %1313 = vrot.lane.b32.xlu1 %v1687_v30, %s2094_s30 }
 0x953   : > { %1311 = vrot.lane.b32.xlu1 %v1286_v32, %s2094_s30 }
 0x957   : > { %1340 = vperm.xlu1 %1858, %v1899_v16  }
 0x95b   : > { %1859 = vset.pattern.permute.xlu1 %v2087_v47 }
 0x95c   : > { %1350 = vperm.xlu1 %1859, %v1897_v63  }
 0x960   : > { %1861 = vset.pattern.permute.xlu1 %v2089_v29 }
 0x961   : > { %1364 = vperm.xlu1 %1861, %v1897_v63  }
 0x965   : > { %1368 = vperm.xlu1 %1861, %v1899_v16  }
 0x969   : > { %1863 = vset.pattern.permute.xlu1 %v2091_v11 }
 0x96a   : > { %1382 = vperm.xlu1 %1863, %v1899_v16  }
 0x99a   : > { %v1336_v29 = vpop.permute.xlu0 %1335 }
 0x99f   : > { %v1355_v39 = vpop.permute.xlu0 %1354 }
 0x9a4   : > { %v1379_v13 = vpop.permute.xlu0 %1378 }
 0x9c1   : > { %v1314_v21 = vpop.permute.xlu1 %1313 }
 0x9c2   : > { %v1318_v2 = vadd.f32 %v1314_v21, %v1308_v36 }
 0x9c4   : > { %1321 = vst.msk [vmem:[#allocation4 + $0x8] sm:$0xff] %vm1319_vm11, %v1318_v2 }
 0x9c5   : > { %v1312_v47 = vpop.permute.xlu1 %1311 }
 0x9c6   : > { %v1317_v0 = vadd.f32 %v1312_v47, %v1307_v9 }
 0x9c8   : > { %1320 = vst.msk [vmem:[#allocation4] sm:$0xff] %vm1319_vm11, %v1317_v0 }
 0x9cb   : > { %v1332_v11 = vld [vmem:[#allocation4 + $0x8] sm:$0xff] }
 0x9cf   : > { %v1331_v17 = vld [vmem:[#allocation4] sm:$0xff] }
 0x9d0   : > { %v1343_v25 = vmul.f32 %v1336_v29, %v1331_v17 }
 0x9d2   : > { %1345 = vst.msk [vmem:[#allocation4] sm:$0xff] %vm323_vm0, %v1343_v25 }
 0x9d6   : > { %v1341_v26 = vpop.permute.xlu1 %1340 }
 0x9d7   : > { %v1344_v27 = vmul.f32 %v1341_v26, %v1332_v11 }
 0x9d9   : > { %1346 = vst.msk [vmem:[#allocation4 + $0x8] sm:$0xff] %vm323_vm0, %v1344_v27  ;;  %v1347_v31 = vld [vmem:[#allocation4] sm:$0xff] }
 0x9db   : > { %v1351_v28 = vpop.permute.xlu1 %1350 }
 0x9dc   : > { %v1357_v33 = vmul.f32 %v1351_v28, %v1347_v31 }
 0x9de   : > { %1359 = vst.msk [vmem:[#allocation4] sm:$0xff] %vm811_vm9, %v1357_v33 }
 0x9e0   : > { %v1348_v3 = vld [vmem:[#allocation4 + $0x8] sm:$0xff]  ;;  %v1365_v40 = vpop.permute.xlu1 %1364 }
 0x9e1   : > { %v1358_v56 = vmul.f32 %v1355_v39, %v1348_v3 }
 0x9e3   : > { %1360 = vst.msk [vmem:[#allocation4 + $0x8] sm:$0xff] %vm811_vm9, %v1358_v56 }
 0x9e4   : > { %v1369_v45 = vpop.permute.xlu1 %1368 }
 0x9e5   : > { %v1361_v43 = vld [vmem:[#allocation4] sm:$0xff] }
 0x9e6   : > { %v1371_v44 = vmul.f32 %v1365_v40, %v1361_v43 }
 0x9e8   : > { %1373 = vst.msk [vmem:[#allocation4] sm:$0xff] %vm1065_vm10, %v1371_v44 }
 0x9e9   : > { %v1383_v58 = vpop.permute.xlu1 %1382 }
 0x9ea   : > { %v1362_v46 = vld [vmem:[#allocation4 + $0x8] sm:$0xff] }
 0x9eb   : > { %v1372_v49 = vmul.f32 %v1369_v45, %v1362_v46 }
 0x9ed   : > { %1374 = vst.msk [vmem:[#allocation4 + $0x8] sm:$0xff] %vm1065_vm10, %v1372_v49 }
 0x9ef   : > { %v1375_v51 = vld [vmem:[#allocation4] sm:$0xff] }
 0x9f0   : > { %v1385_v57 = vmul.f32 %v1379_v13, %v1375_v51 }
 0x9f2   : > { %1387 = vst.msk [vmem:[#allocation4] sm:$0xff] %vm1319_vm11, %v1385_v57 }
 0x9f4   : > { %v1376_v59 = vld [vmem:[#allocation4 + $0x8] sm:$0xff] }
 0x9f5   : > { %v1386_v60 = vmul.f32 %v1383_v58, %v1376_v59 }
 0x9f7   : > { %1388 = vst.msk [vmem:[#allocation4 + $0x8] sm:$0xff] %vm1319_vm11, %v1386_v60 }
 0x9f9   : > { %v1389_v14 = vld [vmem:[#allocation4] sm:$0xff] }
 0x9fa   : > { %1392 = vst.msk [vmem:[%s298_s8] sm:$0xff] %vm312_vm8, %v1389_v14 }
 0x9fe   : > { %v1390_v19 = vld [vmem:[#allocation4 + $0x8] sm:$0xff] }
 0x9ff   : > { %1393 = vst.msk [vmem:[%s298_s8 + $0x8] sm:$0xff] %vm312_vm8, %v1390_v19 }
 0xa00   : > { %2003 = shalt.err (!%p2000_p13)
}
 0xa01   : > { %s2004_s11 = scalar_lea.hbm %s2624_s29, 256  ;;  %s2008_s18 = scalar_lea.hbm %s2680_s3, 512 }
 0xa02   : > { %p2005_p11 = scmp.ne.s32.totalorder %s2624_s29, %s2004_s11  ;;  %p2009_p7 = scmp.lt.u32.totalorder %s2624_s29, %s2680_s3 }
 0xa03   : > { %p2010_p4 = scmp.lt.u32.totalorder %s2008_s18, %s2004_s11  ;;  %p2012_p0 = scmp.lt.u32.totalorder %s2004_s11, %s2624_s29 }
 0xa04   : > { %p2006_p2 = pnand %p2005_p11, %p2711_p10 }
 0xa05   : > { %p2011_p3 = por %p2010_p4, %p2009_p7 }
 0xa06   : > { %p2007_p5 = pneg %p2006_p2 }
 0xa07   : > { %p2013_p8 = por %p2012_p0, %p2011_p3 }
 0xa09   : > { %p2014_p9 = pnand %p2013_p8, %p2007_p5 }
 0xa0b   : > { %2017 = shalt.err (!%p2014_p9)
}
 0xa0c   : > { %s2096_s20 = smov 128  }
 0xa0d   : > { %1734 = dma.vmem_to_hbm [thread:$0]  (%p2711_p10), %s2626_s26, 256, %s2624_s29, %s1395_s23, %s2096_s20, %s2096_s20, %s2093_s7  }
 0xa0e PF: > { %s1425_s5 = sand.u32 1, %s2056_s12   ;;  %p2712_p12 = scmp.ne.s32.totalorder %s2697_s27, 0 }
 0xa0f   : > { %p2713_p1 = scmp.ge.s32.totalorder %s2076_s17, 2  ;;  %s1426_s30 = scalar_lea.sflag [#allocation7], %s1425_s5 }
 0xa11   : > { %p1747_p6 = pnand %p2713_p1, %p2712_p12 }
 0xa13   : > { %2051 = dma.done.wait (!%p1747_p6), %s1426_s30, 256  }
 0xa14   : > { %2053 = vsyncadd (!%p1747_p6), %s1426_s30, 4294967040  ;;  %s22_s17 = sadd.s32 1, %s2076_s17   ;;  %s2714_s25 = sld [smem:[#allocation17_spill]] }
 0xa15   : > { %p19_p13 = scmp.ge.s32.totalorder %s22_s17, 4   ;;  %s2715_s15 = sld [smem:[#allocation15_spill]] }
 0xa16   : > { %s2716_s16 = sld [smem:[#allocation16_spill]]  ;;  %s2717_s12 = smov %s2060_s13 }
 0xa17   : > { %s2718_s13 = smov %s2064_s14  ;;  %21 = sbr.rel (!%p19_p13) target bundleno = 10 (0xa), region = 109 }
 0xa1a   : > { %s2719_s14 = smov %s2714_s25 }
 0xa1e   :  { %1431 = vsyncpa [#allocation6], 1 }
 0xa1f   :  { %1433 = vsyncpa [#allocation6 + $0x1], 1 }
 0xa20   :  { %1434 = vsyncpa [#allocation9], 1 }
 0xa21   :  { %1436 = vsyncpa [#allocation9 + $0x1], 1 }
 0xa22   :  { %1437 = vsyncpa [#allocation7], 1 }
 0xa23   :  { %1439 = vsyncpa [#allocation7 + $0x1], 1 }

</bundles_post_ra>
